<compile_context>
chip_gen: v7x
topology: tpu7x:2x2x1
jax: 0.10.0
libtpu: 0.0.40
codegen_flags: <defaults>
</compile_context>

<pallas_src>
import functools

import jax
import jax.numpy as jnp
from jax.experimental import pallas as pl
from jax.experimental.pallas import tpu as pltpu


def _round_up(n, m):
    return ((n + m - 1) // m) * m


def vae_forward_kernel(
    x_ref, eps_ref,
    w_enc_ref, b_enc_ref, w_ml_ref, b_ml_ref,
    w_dec_ref, b_dec_ref, w_out_ref, b_out_ref,
    slab_ref, xr_ref,
    *, n_latent, pad,
):
    L = n_latent

    x = x_ref[...].astype(jnp.float32)      # (tb, G)
    eps = eps_ref[...].astype(jnp.float32)  # (tb, L)

    # ---- inference (encoder) ----
    h = jnp.dot(x, w_enc_ref[...], preferred_element_type=jnp.float32) + b_enc_ref[...]
    h = jnp.maximum(h, 0.0)
    # fused mu|logvar projection: one (H, 2L) matmul instead of two (H, L) ones
    ml = jnp.dot(h, w_ml_ref[...], preferred_element_type=jnp.float32) + b_ml_ref[...]
    mu = ml[:, :L]
    lv = ml[:, L:]
    std = jnp.exp(0.5 * lv)                 # single EUP exp; exp(lv) = std * std below
    z = mu + std * eps

    # ---- generative (decoder) ----
    hd = jnp.dot(z, w_dec_ref[...], preferred_element_type=jnp.float32) + b_dec_ref[...]
    hd = jnp.maximum(hd, 0.0)
    xr = jnp.dot(hd, w_out_ref[...], preferred_element_type=jnp.float32) + b_out_ref[...]

    # ---- loss components (SCVILoss per-observation terms) ----
    diff = x - xr
    rec = jnp.sum(diff * diff, axis=-1, keepdims=True)                       # (tb, 1)
    kl = -0.5 * jnp.sum(1.0 + lv - mu * mu - std * std, axis=-1, keepdims=True)

    # ---- lane-dense writeback ----
    xr_ref[...] = xr.astype(xr_ref.dtype)
    # pack [mu | lv | z | rec | kl | zero-pad] into one 128-multiple-wide slab
    slab_ref[:, 0:L] = mu
    slab_ref[:, L:2 * L] = lv
    slab_ref[:, 2 * L:3 * L] = z
    slab_ref[:, 3 * L:3 * L + 1] = rec
    slab_ref[:, 3 * L + 1:3 * L + 2] = kl
    if pad > 0:
        slab_ref[:, 3 * L + 2:] = jnp.zeros((slab_ref.shape[0], pad), jnp.float32)


def vae_forward(x, eps, params, *, tile_b=128):
    B, G = x.shape
    H = params["w_enc"].shape[1]
    L = params["w_mu"].shape[1]

    tile_b = min(tile_b, B)
    assert B % tile_b == 0, "batch must be divisible by the batch tile"

    # lane-dense slab width: [mu | lv | z | rec | kl] padded to a multiple of 128
    W = _round_up(3 * L + 2, 128)
    pad = W - (3 * L + 2)

    # fuse mu / logvar projection weights (wrapper-side layout plumbing)
    w_ml = jnp.concatenate([params["w_mu"], params["w_lv"]], axis=1)   # (H, 2L)
    b_ml = jnp.concatenate([params["b_mu"], params["b_lv"]], axis=1)   # (1, 2L)

    grid = (B // tile_b,)

    def full(shape):
        # whole-array block, grid-invariant
        return pl.BlockSpec(shape, lambda i: (0,) * len(shape))

    in_specs = [
        pl.BlockSpec((tile_b, G), lambda i: (i, 0)),   # x
        pl.BlockSpec((tile_b, L), lambda i: (i, 0)),   # eps
        full((G, H)), full((1, H)),                    # w_enc, b_enc
        full((H, 2 * L)), full((1, 2 * L)),            # fused w_mu|w_lv, b_mu|b_lv
        full((L, H)), full((1, H)),                    # w_dec, b_dec
        full((H, G)), full((1, G)),                    # w_out, b_out
    ]

    out_specs = [
        pl.BlockSpec((tile_b, W), lambda i: (i, 0)),   # packed [mu|lv|z|rec|kl]
        pl.BlockSpec((tile_b, G), lambda i: (i, 0)),   # x_recon
    ]

    out_shape = [
        jax.ShapeDtypeStruct((B, W), jnp.float32),
        jax.ShapeDtypeStruct((B, G), jnp.float32),
    ]

    kernel = functools.partial(vae_forward_kernel, n_latent=L, pad=pad)

    slab, xr = pl.pallas_call(
        kernel,
        out_shape=out_shape,
        grid_spec=pltpu.PrefetchScalarGridSpec(
            num_scalar_prefetch=0,
            grid=grid,
            in_specs=in_specs,
            out_specs=out_specs,
        ),
        compiler_params=pltpu.CompilerParams(
            # no resident accumulator -> batch axis is fully parallel (v7x megacore)
            dimension_semantics=("parallel",),
            vmem_limit_bytes=64 * 1024 * 1024,
        ),
    )(
        x, eps,
        params["w_enc"], params["b_enc"],
        w_ml, b_ml,
        params["w_dec"], params["b_dec"],
        params["w_out"], params["b_out"],
    )

    # unpack lane-dense slab (layout plumbing, negligible cost)
    mu = slab[:, :L]
    lv = slab[:, L:2 * L]
    z = slab[:, 2 * L:3 * L]
    rec = slab[:, 3 * L]
    kl = slab[:, 3 * L + 1]
    loss = jnp.mean(rec + kl)   # scalar SCVILoss.loss, computed wrapper-side

    inference_outputs = {"qz_m": mu, "qz_v_log": lv, "z": z}
    generative_outputs = {"px_mean": xr}
    scvi_loss = {
        "loss": loss,
        "reconstruction_loss": rec,
        "kl_local": kl,
        "kl_global": jnp.zeros((), jnp.float32),
    }
    return inference_outputs, generative_outputs, scvi_loss


def _reference(x, eps, p):
    hp = jax.lax.Precision.HIGHEST
    h = jnp.maximum(jnp.dot(x, p["w_enc"], precision=hp) + p["b_enc"], 0.0)
    mu = jnp.dot(h, p["w_mu"], precision=hp) + p["b_mu"]
    lv = jnp.dot(h, p["w_lv"], precision=hp) + p["b_lv"]
    z = mu + jnp.exp(0.5 * lv) * eps
    hd = jnp.maximum(jnp.dot(z, p["w_dec"], precision=hp) + p["b_dec"], 0.0)
    xr = jnp.dot(hd, p["w_out"], precision=hp) + p["b_out"]
    rec = jnp.sum((x - xr) ** 2, axis=-1)
    kl = -0.5 * jnp.sum(1.0 + lv - mu**2 - jnp.exp(lv), axis=-1)
    return jnp.mean(rec + kl), rec, kl, xr


if __name__ == "__main__":
    B, G, H, L = 256, 256, 128, 32   # batch, genes, hidden, latent
    key = jax.random.PRNGKey(0)
    kx, ke, *kw = jax.random.split(key, 12)

    x = jax.random.normal(kx, (B, G), jnp.float32)
    eps = jax.random.normal(ke, (B, L), jnp.float32)

    def init(k, shape, fan_in):
        return (jax.random.normal(k, shape, jnp.float32) / jnp.sqrt(fan_in)).astype(jnp.float32)

    params = {
        "w_enc": init(kw[0], (G, H), G), "b_enc": jnp.zeros((1, H), jnp.float32),
        "w_mu":  init(kw[1], (H, L), H), "b_mu":  jnp.zeros((1, L), jnp.float32),
        "w_lv":  init(kw[2], (H, L), H) * 0.1, "b_lv": jnp.zeros((1, L), jnp.float32),
        "w_dec": init(kw[3], (L, H), L), "b_dec": jnp.zeros((1, H), jnp.float32),
        "w_out": init(kw[4], (H, G), H), "b_out": jnp.zeros((1, G), jnp.float32),
    }

    inf_out, gen_out, losses = jax.block_until_ready(
        jax.jit(lambda a, b: vae_forward(a, b, params))(x, eps)
    )

    # sanity check against a pure-JAX reference
    ref_loss, ref_rec, ref_kl, ref_xr = _reference(x, eps, params)
    assert jnp.allclose(losses["loss"], ref_loss, rtol=1e-3, atol=1e-2)
    assert jnp.allclose(losses["reconstruction_loss"], ref_rec, rtol=1e-3, atol=5e-2)
    assert jnp.allclose(losses["kl_local"], ref_kl, rtol=1e-3, atol=1e-2)
    assert jnp.allclose(gen_out["px_mean"], ref_xr, rtol=1e-3, atol=1e-2)

    print("KERNEL_OK")
</pallas_src>

<mosaic_0001>
module attributes {stable_mosaic.version = 11 : i64} {
  func.func @vae_forward_kernel(%arg0: i32, %arg1: memref<128x256xf32, #tpu.memory_space<vmem>>, %arg2: memref<128x32xf32, #tpu.memory_space<vmem>>, %arg3: memref<256x128xf32, #tpu.memory_space<vmem>>, %arg4: memref<1x128xf32, #tpu.memory_space<vmem>>, %arg5: memref<128x64xf32, #tpu.memory_space<vmem>>, %arg6: memref<1x64xf32, #tpu.memory_space<vmem>>, %arg7: memref<32x128xf32, #tpu.memory_space<vmem>>, %arg8: memref<1x128xf32, #tpu.memory_space<vmem>>, %arg9: memref<128x256xf32, #tpu.memory_space<vmem>>, %arg10: memref<1x256xf32, #tpu.memory_space<vmem>>, %arg11: memref<128x128xf32, #tpu.memory_space<vmem>>, %arg12: memref<128x256xf32, #tpu.memory_space<vmem>>) attributes {dimension_semantics = [#tpu.dimension_semantics<parallel>], iteration_bounds = array<i64: 2>, scalar_prefetch = 0 : i64, scratch_operands = 0 : i64, tpu.core_type = #tpu.core_type<tc>, window_params = [{transform_indices = @transform_0, window_bounds = array<i64: 128, 256>}, {transform_indices = @transform_1, window_bounds = array<i64: 128, 32>}, {pipeline_mode = #tpu.pipeline_mode<synchronous>, transform_indices = @transform_2, window_bounds = array<i64: 256, 128>}, {pipeline_mode = #tpu.pipeline_mode<synchronous>, transform_indices = @transform_3, window_bounds = array<i64: 1, 128>}, {pipeline_mode = #tpu.pipeline_mode<synchronous>, transform_indices = @transform_4, window_bounds = array<i64: 128, 64>}, {pipeline_mode = #tpu.pipeline_mode<synchronous>, transform_indices = @transform_5, window_bounds = array<i64: 1, 64>}, {pipeline_mode = #tpu.pipeline_mode<synchronous>, transform_indices = @transform_6, window_bounds = array<i64: 32, 128>}, {pipeline_mode = #tpu.pipeline_mode<synchronous>, transform_indices = @transform_7, window_bounds = array<i64: 1, 128>}, {pipeline_mode = #tpu.pipeline_mode<synchronous>, transform_indices = @transform_8, window_bounds = array<i64: 128, 256>}, {pipeline_mode = #tpu.pipeline_mode<synchronous>, transform_indices = @transform_9, window_bounds = array<i64: 1, 256>}, {transform_indices = @transform_10, window_bounds = array<i64: 128, 128>}, {transform_indices = @transform_11, window_bounds = array<i64: 128, 256>}]} {
    %c0 = arith.constant 0 : index
    %c0_0 = arith.constant 0 : index
    %0 = vector.load %arg1[%c0, %c0_0] : memref<128x256xf32, #tpu.memory_space<vmem>>, vector<128x256xf32>
    %c0_1 = arith.constant 0 : index
    %c0_2 = arith.constant 0 : index
    %1 = vector.load %arg2[%c0_1, %c0_2] : memref<128x32xf32, #tpu.memory_space<vmem>>, vector<128x32xf32>
    %c0_3 = arith.constant 0 : index
    %c0_4 = arith.constant 0 : index
    %2 = vector.load %arg3[%c0_3, %c0_4] : memref<256x128xf32, #tpu.memory_space<vmem>>, vector<256x128xf32>
    %cst = arith.constant dense<0.000000e+00> : vector<128x128xf32>
    %3 = tpu.matmul %0, %2, %cst {dimension_numbers = #tpu.dot_dimension_numbers<[1], [0], [0], [1], [0, 0, 1, 1], [], []>} : vector<128x256xf32>, vector<256x128xf32>, vector<128x128xf32> -> vector<128x128xf32>
    %c0_5 = arith.constant 0 : index
    %c0_6 = arith.constant 0 : index
    %4 = vector.load %arg4[%c0_5, %c0_6] : memref<1x128xf32, #tpu.memory_space<vmem>>, vector<1x128xf32>
    %5 = vector.broadcast %4 : vector<1x128xf32> to vector<128x128xf32>
    %6 = arith.addf %3, %5 : vector<128x128xf32>
    %cst_7 = arith.constant 0.000000e+00 : f32
    %7 = vector.broadcast %cst_7 : f32 to vector<128x128xf32>
    %8 = arith.maximumf %6, %7 : vector<128x128xf32>
    %c0_8 = arith.constant 0 : index
    %c0_9 = arith.constant 0 : index
    %9 = vector.load %arg5[%c0_8, %c0_9] : memref<128x64xf32, #tpu.memory_space<vmem>>, vector<128x64xf32>
    %cst_10 = arith.constant dense<0.000000e+00> : vector<128x64xf32>
    %10 = tpu.matmul %8, %9, %cst_10 {dimension_numbers = #tpu.dot_dimension_numbers<[1], [0], [0], [1], [0, 0, 1, 1], [], []>} : vector<128x128xf32>, vector<128x64xf32>, vector<128x64xf32> -> vector<128x64xf32>
    %c0_11 = arith.constant 0 : index
    %c0_12 = arith.constant 0 : index
    %11 = vector.load %arg6[%c0_11, %c0_12] : memref<1x64xf32, #tpu.memory_space<vmem>>, vector<1x64xf32>
    %12 = vector.broadcast %11 : vector<1x64xf32> to vector<128x64xf32>
    %13 = arith.addf %10, %12 : vector<128x64xf32>
    %14 = vector.extract_strided_slice %13 {offsets = [0, 0], sizes = [128, 32], strides = [1, 1]} : vector<128x64xf32> to vector<128x32xf32>
    %15 = vector.extract_strided_slice %13 {offsets = [0, 32], sizes = [128, 32], strides = [1, 1]} : vector<128x64xf32> to vector<128x32xf32>
    %cst_13 = arith.constant 5.000000e-01 : f32
    %16 = vector.broadcast %cst_13 : f32 to vector<128x32xf32>
    %17 = arith.mulf %16, %15 : vector<128x32xf32>
    %18 = math.exp %17 : vector<128x32xf32>
    %19 = arith.mulf %18, %1 : vector<128x32xf32>
    %20 = arith.addf %14, %19 : vector<128x32xf32>
    %c0_14 = arith.constant 0 : index
    %c0_15 = arith.constant 0 : index
    %21 = vector.load %arg7[%c0_14, %c0_15] : memref<32x128xf32, #tpu.memory_space<vmem>>, vector<32x128xf32>
    %cst_16 = arith.constant dense<0.000000e+00> : vector<128x128xf32>
    %22 = tpu.matmul %20, %21, %cst_16 {dimension_numbers = #tpu.dot_dimension_numbers<[1], [0], [0], [1], [0, 0, 1, 1], [], []>} : vector<128x32xf32>, vector<32x128xf32>, vector<128x128xf32> -> vector<128x128xf32>
    %c0_17 = arith.constant 0 : index
    %c0_18 = arith.constant 0 : index
    %23 = vector.load %arg8[%c0_17, %c0_18] : memref<1x128xf32, #tpu.memory_space<vmem>>, vector<1x128xf32>
    %24 = vector.broadcast %23 : vector<1x128xf32> to vector<128x128xf32>
    %25 = arith.addf %22, %24 : vector<128x128xf32>
    %cst_19 = arith.constant 0.000000e+00 : f32
    %26 = vector.broadcast %cst_19 : f32 to vector<128x128xf32>
    %27 = arith.maximumf %25, %26 : vector<128x128xf32>
    %c0_20 = arith.constant 0 : index
    %c0_21 = arith.constant 0 : index
    %28 = vector.load %arg9[%c0_20, %c0_21] : memref<128x256xf32, #tpu.memory_space<vmem>>, vector<128x256xf32>
    %cst_22 = arith.constant dense<0.000000e+00> : vector<128x256xf32>
    %29 = tpu.matmul %27, %28, %cst_22 {dimension_numbers = #tpu.dot_dimension_numbers<[1], [0], [0], [1], [0, 0, 1, 1], [], []>} : vector<128x128xf32>, vector<128x256xf32>, vector<128x256xf32> -> vector<128x256xf32>
    %c0_23 = arith.constant 0 : index
    %c0_24 = arith.constant 0 : index
    %30 = vector.load %arg10[%c0_23, %c0_24] : memref<1x256xf32, #tpu.memory_space<vmem>>, vector<1x256xf32>
    %31 = vector.broadcast %30 : vector<1x256xf32> to vector<128x256xf32>
    %32 = arith.addf %29, %31 : vector<128x256xf32>
    %33 = arith.subf %0, %32 : vector<128x256xf32>
    %34 = arith.mulf %33, %33 : vector<128x256xf32>
    %cst_25 = arith.constant dense<0.000000e+00> : vector<128xf32>
    %35 = vector.multi_reduction <add>, %34, %cst_25 [1] : vector<128x256xf32> to vector<128xf32>
    %36 = vector.shape_cast %35 : vector<128xf32> to vector<128x1xf32>
    %cst_26 = arith.constant 1.000000e+00 : f32
    %37 = vector.broadcast %cst_26 : f32 to vector<128x32xf32>
    %38 = arith.addf %37, %15 : vector<128x32xf32>
    %39 = arith.mulf %14, %14 : vector<128x32xf32>
    %40 = arith.subf %38, %39 : vector<128x32xf32>
    %41 = arith.mulf %18, %18 : vector<128x32xf32>
    %42 = arith.subf %40, %41 : vector<128x32xf32>
    %cst_27 = arith.constant dense<0.000000e+00> : vector<128xf32>
    %43 = vector.multi_reduction <add>, %42, %cst_27 [1] : vector<128x32xf32> to vector<128xf32>
    %44 = vector.shape_cast %43 : vector<128xf32> to vector<128x1xf32>
    %cst_28 = arith.constant -5.000000e-01 : f32
    %45 = vector.broadcast %cst_28 : f32 to vector<128x1xf32>
    %46 = arith.mulf %45, %44 : vector<128x1xf32>
    %c0_29 = arith.constant 0 : index
    %c0_30 = arith.constant 0 : index
    %47 = vector.load %arg12[%c0_29, %c0_30] : memref<128x256xf32, #tpu.memory_space<vmem>>, vector<128x256xf32>
    tpu.vector_store %arg12[%c0_29, %c0_30], %32 {strides = array<i32>} : memref<128x256xf32, #tpu.memory_space<vmem>>, vector<128x256xf32>,
    %c0_31 = arith.constant 0 : index
    %c0_32 = arith.constant 0 : index
    %48 = vector.load %arg11[%c0_31, %c0_32] : memref<128x128xf32, #tpu.memory_space<vmem>>, vector<128x32xf32>
    tpu.vector_store %arg11[%c0_31, %c0_32], %14 {strides = array<i32>} : memref<128x128xf32, #tpu.memory_space<vmem>>, vector<128x32xf32>,
    %c0_33 = arith.constant 0 : index
    %c32 = arith.constant 32 : index
    %49 = vector.load %arg11[%c0_33, %c32] : memref<128x128xf32, #tpu.memory_space<vmem>>, vector<128x32xf32>
    tpu.vector_store %arg11[%c0_33, %c32], %15 {strides = array<i32>} : memref<128x128xf32, #tpu.memory_space<vmem>>, vector<128x32xf32>,
    %c0_34 = arith.constant 0 : index
    %c64 = arith.constant 64 : index
    %50 = vector.load %arg11[%c0_34, %c64] : memref<128x128xf32, #tpu.memory_space<vmem>>, vector<128x32xf32>
    tpu.vector_store %arg11[%c0_34, %c64], %20 {strides = array<i32>} : memref<128x128xf32, #tpu.memory_space<vmem>>, vector<128x32xf32>,
    %c0_35 = arith.constant 0 : index
    %c96 = arith.constant 96 : index
    %51 = vector.load %arg11[%c0_35, %c96] : memref<128x128xf32, #tpu.memory_space<vmem>>, vector<128x1xf32>
    tpu.vector_store %arg11[%c0_35, %c96], %36 {strides = array<i32>} : memref<128x128xf32, #tpu.memory_space<vmem>>, vector<128x1xf32>,
    %c0_36 = arith.constant 0 : index
    %c97 = arith.constant 97 : index
    %52 = vector.load %arg11[%c0_36, %c97] : memref<128x128xf32, #tpu.memory_space<vmem>>, vector<128x1xf32>
    tpu.vector_store %arg11[%c0_36, %c97], %46 {strides = array<i32>} : memref<128x128xf32, #tpu.memory_space<vmem>>, vector<128x1xf32>,
    %cst_37 = arith.constant 0.000000e+00 : f32
    %53 = vector.broadcast %cst_37 : f32 to vector<128x30xf32>
    %c0_38 = arith.constant 0 : index
    %c98 = arith.constant 98 : index
    %54 = vector.load %arg11[%c0_38, %c98] : memref<128x128xf32, #tpu.memory_space<vmem>>, vector<128x30xf32>
    tpu.vector_store %arg11[%c0_38, %c98], %53 {strides = array<i32>} : memref<128x128xf32, #tpu.memory_space<vmem>>, vector<128x30xf32>,
    return
  }
  func.func @transform_0(%arg0: i32) -> (i32, i32) {
    %c0_i32 = arith.constant 0 : i32
    %c0_i32_0 = arith.constant 0 : i32
    return %arg0, %c0_i32 : i32, i32
  }
  func.func @transform_1(%arg0: i32) -> (i32, i32) {
    %c0_i32 = arith.constant 0 : i32
    %c0_i32_0 = arith.constant 0 : i32
    return %arg0, %c0_i32 : i32, i32
  }
  func.func @transform_2(%arg0: i32) -> (i32, i32) {
    %c0_i32 = arith.constant 0 : i32
    %c0_i32_0 = arith.constant 0 : i32
    %c0_i32_1 = arith.constant 0 : i32
    return %c0_i32, %c0_i32_0 : i32, i32
  }
  func.func @transform_3(%arg0: i32) -> (i32, i32) {
    %c0_i32 = arith.constant 0 : i32
    %c0_i32_0 = arith.constant 0 : i32
    %c0_i32_1 = arith.constant 0 : i32
    return %c0_i32, %c0_i32_0 : i32, i32
  }
  func.func @transform_4(%arg0: i32) -> (i32, i32) {
    %c0_i32 = arith.constant 0 : i32
    %c0_i32_0 = arith.constant 0 : i32
    %c0_i32_1 = arith.constant 0 : i32
    return %c0_i32, %c0_i32_0 : i32, i32
  }
  func.func @transform_5(%arg0: i32) -> (i32, i32) {
    %c0_i32 = arith.constant 0 : i32
    %c0_i32_0 = arith.constant 0 : i32
    %c0_i32_1 = arith.constant 0 : i32
    return %c0_i32, %c0_i32_0 : i32, i32
  }
  func.func @transform_6(%arg0: i32) -> (i32, i32) {
    %c0_i32 = arith.constant 0 : i32
    %c0_i32_0 = arith.constant 0 : i32
    %c0_i32_1 = arith.constant 0 : i32
    return %c0_i32, %c0_i32_0 : i32, i32
  }
  func.func @transform_7(%arg0: i32) -> (i32, i32) {
    %c0_i32 = arith.constant 0 : i32
    %c0_i32_0 = arith.constant 0 : i32
    %c0_i32_1 = arith.constant 0 : i32
    return %c0_i32, %c0_i32_0 : i32, i32
  }
  func.func @transform_8(%arg0: i32) -> (i32, i32) {
    %c0_i32 = arith.constant 0 : i32
    %c0_i32_0 = arith.constant 0 : i32
    %c0_i32_1 = arith.constant 0 : i32
    return %c0_i32, %c0_i32_0 : i32, i32
  }
  func.func @transform_9(%arg0: i32) -> (i32, i32) {
    %c0_i32 = arith.constant 0 : i32
    %c0_i32_0 = arith.constant 0 : i32
    %c0_i32_1 = arith.constant 0 : i32
    return %c0_i32, %c0_i32_0 : i32, i32
  }
  func.func @transform_10(%arg0: i32) -> (i32, i32) {
    %c0_i32 = arith.constant 0 : i32
    %c0_i32_0 = arith.constant 0 : i32
    return %arg0, %c0_i32 : i32, i32
  }
  func.func @transform_11(%arg0: i32) -> (i32, i32) {
    %c0_i32 = arith.constant 0 : i32
    %c0_i32_0 = arith.constant 0 : i32
    return %arg0, %c0_i32 : i32, i32
  }
}

</mosaic_0001>

<bundles_post_ra>
// kernel: _lambda_.1
= control target key start
LH: loop header
LB: loop body
LE: loop exit
PB: predicated region body
PF: predicated region fallthrough
CT: control target
= control target key end

     0   :  { %s4851_s0 = inlined_call_operand.hbm [shape: f32[256,256], index: 0, kind: input, shape index: {}]   ;;  %s4852_s1 = inlined_call_operand.hbm [shape: f32[256,32], index: 1, kind: input, shape index: {}]   ;;  %s4853_s2 = inlined_call_operand.hbm [shape: f32[256,128], index: 2, kind: input, shape index: {}]   ;;  %s4854_s3 = inlined_call_operand.hbm [shape: f32[1,128], index: 3, kind: input, shape index: {}, may-alias: {3,7}]   ;;  %s4855_s4 = inlined_call_operand.hbm [shape: f32[128,64], index: 4, kind: input, shape index: {}]   ;;  %s4856_s5 = inlined_call_operand.hbm [shape: f32[1,64], index: 5, kind: input, shape index: {}]   ;;  %s4857_s6 = inlined_call_operand.hbm [shape: f32[32,128], index: 6, kind: input, shape index: {}]   ;;  %s4858_s7 = inlined_call_operand.hbm [shape: f32[1,128], index: 7, kind: input, shape index: {}, may-alias: {3,7}]   ;;  %s4859_s8 = inlined_call_operand.hbm [shape: f32[128,256], index: 8, kind: input, shape index: {}]   ;;  %s4860_s9 = inlined_call_operand.hbm [shape: f32[1,256], index: 9, kind: input, shape index: {}]   ;;  %s4861_s10 = inlined_call_operand.hbm [shape: f32[256,128], index: 10, kind: output, shape index: {0}]   ;;  %s4862_s11 = inlined_call_operand.hbm [shape: f32[256,256], index: 11, kind: output, shape index: {1}]  }
   0x1   :  { %4874 = sst [smem:[#allocation32_spill]] %s4851_s0 }
   0x2   :  { %4875 = sst [smem:[#allocation33_spill]] %s4853_s2 }
   0x3   :  { %4876 = sst [smem:[#allocation34_spill]] %s4854_s3 }
   0x4   :  { %4877 = sst [smem:[#allocation35_spill]] %s4855_s4 }
   0x5   :  { %4878 = sst [smem:[#allocation36_spill]] %s4856_s5 }
   0x6   :  { %4879 = sst [smem:[#allocation37_spill]] %s4857_s6 }
   0x7   :  { %4880 = sst [smem:[#allocation38_spill]] %s4858_s7 }
   0x8   :  { %4881 = sst [smem:[#allocation39_spill]] %s4861_s10 }
   0x9   :  { %4882 = sst [smem:[#allocation40_spill]] %s4862_s11 }
   0xa   :  { %17 = vsyncpa [#allocation3], 0 }
   0xb   :  { %19 = vsyncpa [#allocation3 + $0x1], 0 }
   0xc   :  { %20 = vsyncpa [#allocation6], 0 }
   0xd   :  { %22 = vsyncpa [#allocation6 + $0x1], 0 }
   0xe   :  { %23 = vsyncpa [#allocation9], 0 }
   0xf   :  { %24 = vsyncpa [#allocation12], 0 }
  0x10   :  { %25 = vsyncpa [#allocation15], 0 }
  0x11   :  { %26 = vsyncpa [#allocation18], 0 }
  0x12   :  { %27 = vsyncpa [#allocation4], 0 }
  0x13   :  { %29 = vsyncpa [#allocation4 + $0x1], 0 }
  0x14   :  { %30 = vsyncpa [#allocation21], 0 }
  0x15   :  { %32 = vsyncpa [#allocation21 + $0x1], 0  ;;  %s3534_s17 = smov 0   ;;  %s3536_s18 = smov 0  }
  0x16   :  { %s3538_s19 = smov 0   ;;  %s3540_s20 = smov 0  }
  0x17 LB: > { %s3450_s21 = smov [#allocation7]   ;;  %s3555_s23 = sadd.s32 4294967295, %s3448_s20   ;;  %s3448_s20 = sphi %s3540_s20, %s4925_s20   ;;  %s3444_s19 = sphi %s3538_s19, %s4924_s19   ;;  %s3440_s18 = sphi %s3536_s18, %s4923_s18   ;;  %s3436_s17 = sphi %s3534_s17, %s4922_s17  }
  0x18   : > { %s327_s22 = sshll.u32 %s3450_s21, 4  ;;  %p2425_p0 = scmp.ge.s32.totalorder %s3448_s20, 1  ;;  %s3560_s22 = int_to_ptr.vmem [resolvable:$true] %s327_s22 }
  0x19   : > { %p4868_p1 = scmp.eq.s32.totalorder %s3555_s23, 0  ;;  %p315_p2 = scmp.lt.s32.totalorder %s3448_s20, 3 }
  0x1a   : > { %s3451_s25 = smov [#allocation8]   ;;  %s3452_s28 = smov [#allocation11]  }
  0x1b   : > { %p3562_p3 = pnand %p2425_p0, %p315_p2  ;;  %s341_s26 = sshll.u32 %s3451_s25, 4  ;;  %s3575_s26 = int_to_ptr.vmem [resolvable:$true] %s341_s26 }
  0x1c   : > { %s365_s29 = sshll.u32 %s3452_s28, 4  ;;  %s4886_s2 = sld [smem:[#allocation33_spill]]  ;;  %s3577_s29 = int_to_ptr.vmem [resolvable:$true] %s365_s29 }
  0x1d   : > { %s4883_s24 = scalar_select %p3562_p3, 1, 0 }
  0x1e   : > { %p2869_p5 = pneg %p3562_p3 }
  0x1f   : > { %4884 = sst [smem:[#allocation31_spill]] %s4883_s24 }
  0x20   : > { %p3571_p6 = pnand %p2869_p5, %p4868_p1 }
  0x22   : > { %s3042_s13 = scalar_lea.hbm %s4886_s2, 4096  ;;  %p3587_p8 = pneg %p3571_p6 }
  0x23   : > { %p3043_p7 = scmp.ne.s32.totalorder %s4886_s2, %s3042_s13  ;;  %p3049_p11 = scmp.lt.u32.totalorder %s3042_s13, %s4886_s2 }
  0x25   : > { %p3045_p9 = pnand %p3587_p8, %p3043_p7 }
  0x27   : > { %p3046_p10 = pneg %p3045_p9 }
  0x29   : > { %p3051_p12 = pnand %p3049_p11, %p3046_p10 }
  0x2b   : > { %3054 = shalt.err (!%p3051_p12)
}
  0x2c   : > { %s3055_s28 = scalar_lea.vmem %s3560_s22, 4096  ;;  %p3063_p5 = scmp.lt.s32.totalorder %s3560_s22, %s3560_s22 }
  0x2d   : > { %p3056_p13 = scmp.ne.s32.totalorder %s3560_s22, %s3055_s28  ;;  %p3064_p4 = scmp.lt.s32.totalorder %s3055_s28, %s3055_s28 }
  0x2f   : > { %p3058_p0 = pnand %p3056_p13, %p3587_p8  ;;  %p3065_p7 = por %p3064_p4, %p3063_p5 }
  0x31   : > { %p3059_p2 = pneg %p3058_p0 }
  0x33   : > { %p3066_p9 = pnand %p3065_p7, %p3059_p2 }
  0x35   : > { %3069 = shalt.err (!%p3066_p9)
}
  0x36   : > { %s4866_s30 = smov 128   ;;  %s4870_s12 = smov 8  }
  0x37   : > { %2872 = dma.hbm_to_vmem [thread:$0]  (!%p3571_p6), %s4886_s2, 4096, %s3560_s22, [#allocation6], %s4866_s30, %s4866_s30, %s4870_s12  }
  0x38   : > { %s4888_s3 = sld [smem:[#allocation34_spill]] }
  0x3e   : > { %s3070_s25 = scalar_lea.hbm %s4888_s3, 16 }
  0x3f   : > { %p3071_p4 = scmp.ne.s32.totalorder %s4888_s3, %s3070_s25  ;;  %p3077_p12 = scmp.lt.u32.totalorder %s3070_s25, %s4888_s3 }
  0x41   : > { %p3073_p10 = pnand %p3071_p4, %p3587_p8 }
  0x43   : > { %p3074_p11 = pneg %p3073_p10 }
  0x45   : > { %p3079_p13 = pnand %p3077_p12, %p3074_p11 }
  0x47   : > { %3082 = shalt.err (!%p3079_p13)
}
  0x48   : > { %s3083_s22 = scalar_lea.vmem %s3575_s26, 16  ;;  %s3090_s10 = scalar_lea.vmem %s3575_s26, 32 }
  0x49   : > { %p3084_p0 = scmp.ne.s32.totalorder %s3575_s26, %s3083_s22  ;;  %p3091_p7 = scmp.lt.s32.totalorder %s3575_s26, %s3575_s26 }
  0x4a   : > { %p3092_p9 = scmp.lt.s32.totalorder %s3090_s10, %s3083_s22 }
  0x4b   : > { %p3086_p2 = pnand %p3084_p0, %p3587_p8 }
  0x4c   : > { %p3093_p4 = por %p3092_p9, %p3091_p7 }
  0x4d   : > { %p3087_p5 = pneg %p3086_p2 }
  0x4f   : > { %p3094_p10 = pnand %p3093_p4, %p3087_p5 }
  0x51   : > { %3097 = shalt.err (!%p3094_p10)
}
  0x52   : > { %2875 = dma.hbm_to_vmem [thread:$0]  (!%p3571_p6), %s4888_s3, 16, %s3575_s26, [#allocation9]  }
  0x53   : > { %s4889_s5 = sld [smem:[#allocation36_spill]] }
  0x59   : > { %s3098_s15 = scalar_lea.hbm %s4889_s5, 16 }
  0x5a   : > { %p3099_p11 = scmp.ne.s32.totalorder %s4889_s5, %s3098_s15  ;;  %p3105_p0 = scmp.lt.u32.totalorder %s3098_s15, %s4889_s5 }
  0x5c   : > { %p3101_p12 = pnand %p3099_p11, %p3587_p8 }
  0x5e   : > { %p3102_p13 = pneg %p3101_p12 }
  0x60   : > { %p3107_p2 = pnand %p3105_p0, %p3102_p13 }
  0x62   : > { %3110 = shalt.err (!%p3107_p2)
}
  0x63   : > { %s3111_s26 = scalar_lea.vmem %s3577_s29, 16  ;;  %s3118_s10 = scalar_lea.vmem %s3577_s29, 32 }
  0x64   : > { %p3112_p5 = scmp.ne.s32.totalorder %s3577_s29, %s3111_s26  ;;  %p3119_p4 = scmp.lt.s32.totalorder %s3577_s29, %s3577_s29 }
  0x65   : > { %p3120_p10 = scmp.lt.s32.totalorder %s3118_s10, %s3111_s26 }
  0x66   : > { %p3114_p7 = pnand %p3112_p5, %p3587_p8 }
  0x67   : > { %p3121_p11 = por %p3120_p10, %p3119_p4 }
  0x68   : > { %p3115_p9 = pneg %p3114_p7 }
  0x6a   : > { %p3122_p12 = pnand %p3121_p11, %p3115_p9 }
  0x6c   : > { %3125 = shalt.err (!%p3122_p12)
}
  0x6d   : > { %2881 = dma.hbm_to_vmem [thread:$0]  (!%p3571_p6), %s4889_s5, 16, %s3577_s29, [#allocation12]  }
  0x6e   : > { %s3455_s13 = smov [#allocation14]   ;;  %s3456_s15 = smov [#allocation10]  }
  0x6f   : > { %s389_s14 = sshll.u32 %s3455_s13, 4  ;;  %s351_s21 = sshll.u32 %s3456_s15, 4  ;;  %s390_s14 = int_to_ptr.vmem [resolvable:$true] %s389_s14  ;;  %s352_s21 = int_to_ptr.vmem [resolvable:$true] %s351_s21 }
  0x70   : > { %s4890_s7 = sld [smem:[#allocation38_spill]] }
  0x76   : > { %s3126_s22 = scalar_lea.hbm %s4890_s7, 16 }
  0x77   : > { %p3127_p13 = scmp.ne.s32.totalorder %s4890_s7, %s3126_s22  ;;  %p3133_p5 = scmp.lt.u32.totalorder %s3126_s22, %s4890_s7 }
  0x79   : > { %p3129_p0 = pnand %p3127_p13, %p3587_p8 }
  0x7b   : > { %p3130_p2 = pneg %p3129_p0 }
  0x7d   : > { %p3135_p7 = pnand %p3133_p5, %p3130_p2 }
  0x7f   : > { %3138 = shalt.err (!%p3135_p7)
}
  0x80   : > { %s3139_s29 = scalar_lea.vmem %s390_s14, 16  ;;  %s3146_s24 = scalar_lea.vmem %s390_s14, 32 }
  0x81   : > { %p3140_p9 = scmp.ne.s32.totalorder %s390_s14, %s3139_s29  ;;  %p3147_p11 = scmp.lt.s32.totalorder %s390_s14, %s390_s14 }
  0x82   : > { %p3148_p12 = scmp.lt.s32.totalorder %s3146_s24, %s3139_s29 }
  0x83   : > { %p3142_p4 = pnand %p3140_p9, %p3587_p8 }
  0x84   : > { %p3149_p1 = por %p3148_p12, %p3147_p11 }
  0x85   : > { %p3143_p10 = pneg %p3142_p4 }
  0x87   : > { %p3150_p3 = pnand %p3149_p1, %p3143_p10 }
  0x89   : > { %3153 = shalt.err (!%p3150_p3)
}
  0x8a   : > { %2887 = dma.hbm_to_vmem [thread:$0]  (!%p3571_p6), %s4890_s7, 16, %s390_s14, [#allocation15]  }
  0x8b   : > { %s4891_s4 = sld [smem:[#allocation35_spill]] }
  0x91   : > { %s3154_s28 = scalar_lea.hbm %s4891_s4, 2048 }
  0x92   : > { %p3155_p13 = scmp.ne.s32.totalorder %s4891_s4, %s3154_s28  ;;  %p3161_p3 = scmp.lt.u32.totalorder %s3154_s28, %s4891_s4 }
  0x94   : > { %p3157_p0 = pnand %p3155_p13, %p3587_p8 }
  0x96   : > { %p3158_p1 = pneg %p3157_p0 }
  0x98   : > { %p3163_p2 = pnand %p3161_p3, %p3158_p1 }
  0x9a   : > { %3166 = shalt.err (!%p3163_p2)
}
  0x9b   : > { %s3167_s29 = scalar_lea.vmem %s352_s21, 2048  ;;  %p3175_p4 = scmp.lt.s32.totalorder %s352_s21, %s352_s21 }
  0x9c   : > { %p3168_p5 = scmp.ne.s32.totalorder %s352_s21, %s3167_s29  ;;  %p3176_p10 = scmp.lt.s32.totalorder %s3167_s29, %s3167_s29 }
  0x9e   : > { %p3170_p7 = pnand %p3168_p5, %p3587_p8  ;;  %p3177_p11 = por %p3176_p10, %p3175_p4 }
  0xa0   : > { %p3171_p9 = pneg %p3170_p7 }
  0xa2   : > { %p3178_p12 = pnand %p3177_p11, %p3171_p9 }
  0xa4   : > { %3181 = shalt.err (!%p3178_p12)
}
  0xa5   : > { %s4892_s14 = smov 128   ;;  %s3457_s15 = smov [#allocation13]  }
  0xa6   : > { %2878 = dma.hbm_to_vmem [thread:$0]  (!%p3571_p6), %s4891_s4, 2048, %s352_s21, [#allocation9], %s4892_s14, %s4892_s14, %s4870_s12  }
  0xa7   : > { %s375_s30 = sshll.u32 %s3457_s15, 4  ;;  %s3458_s25 = smov [#allocation16]   ;;  %s376_s30 = int_to_ptr.vmem [resolvable:$true] %s375_s30 }
  0xa8   : > { %s399_s28 = sshll.u32 %s3458_s25, 4  ;;  %s4893_s6 = sld [smem:[#allocation37_spill]]  ;;  %s400_s28 = int_to_ptr.vmem [resolvable:$true] %s399_s28 }
  0xae   : > { %s3182_s10 = scalar_lea.hbm %s4893_s6, 512 }
  0xaf   : > { %p3183_p13 = scmp.ne.s32.totalorder %s4893_s6, %s3182_s10  ;;  %p3189_p3 = scmp.lt.u32.totalorder %s3182_s10, %s4893_s6 }
  0xb1   : > { %p3185_p0 = pnand %p3183_p13, %p3587_p8 }
  0xb3   : > { %p3186_p1 = pneg %p3185_p0 }
  0xb5   : > { %p3191_p2 = pnand %p3189_p3, %p3186_p1 }
  0xb7   : > { %3194 = shalt.err (!%p3191_p2)
}
  0xb8   : > { %s3195_s21 = scalar_lea.vmem %s376_s30, 512  ;;  %p3203_p4 = scmp.lt.s32.totalorder %s376_s30, %s376_s30 }
  0xb9   : > { %p3196_p5 = scmp.ne.s32.totalorder %s376_s30, %s3195_s21  ;;  %p3204_p10 = scmp.lt.s32.totalorder %s3195_s21, %s3195_s21 }
  0xbb   : > { %p3198_p7 = pnand %p3196_p5, %p3587_p8  ;;  %p3205_p11 = por %p3204_p10, %p3203_p4 }
  0xbd   : > { %p3199_p9 = pneg %p3198_p7 }
  0xbf   : > { %p3206_p12 = pnand %p3205_p11, %p3199_p9 }
  0xc1   : > { %3209 = shalt.err (!%p3206_p12)
}
  0xc2   : > { %2884 = dma.hbm_to_vmem [thread:$0]  (!%p3571_p6), %s4893_s6, 512, %s376_s30, [#allocation12], %s4892_s14, %s4892_s14, %s4870_s12  }
  0xc3   : > { %s3210_s22 = scalar_lea.hbm %s4859_s8, 4096 }
  0xc4   : > { %p3211_p13 = scmp.ne.s32.totalorder %s4859_s8, %s3210_s22  ;;  %p3217_p3 = scmp.lt.u32.totalorder %s3210_s22, %s4859_s8 }
  0xc6   : > { %p3213_p0 = pnand %p3211_p13, %p3587_p8 }
  0xc8   : > { %p3214_p1 = pneg %p3213_p0 }
  0xca   : > { %p3219_p2 = pnand %p3217_p3, %p3214_p1 }
  0xcc   : > { %3222 = shalt.err (!%p3219_p2)
}
  0xcd   : > { %s3223_s24 = scalar_lea.vmem %s400_s28, 4096  ;;  %p3231_p4 = scmp.lt.s32.totalorder %s400_s28, %s400_s28 }
  0xce   : > { %p3224_p5 = scmp.ne.s32.totalorder %s400_s28, %s3223_s24  ;;  %p3232_p10 = scmp.lt.s32.totalorder %s3223_s24, %s3223_s24 }
  0xd0   : > { %p3226_p7 = pnand %p3224_p5, %p3587_p8  ;;  %p3233_p11 = por %p3232_p10, %p3231_p4 }
  0xd2   : > { %p3227_p9 = pneg %p3226_p7 }
  0xd4   : > { %p3234_p12 = pnand %p3233_p11, %p3227_p9 }
  0xd6   : > { %3237 = shalt.err (!%p3234_p12)
}
  0xd7   : > { %s4871_s30 = smov 256   ;;  %s4872_s21 = smov 16  }
  0xd8   : > { %2890 = dma.hbm_to_vmem [thread:$0]  (!%p3571_p6), %s4859_s8, 4096, %s400_s28, [#allocation15], %s4871_s30, %s4871_s30, %s4872_s21  }
  0xd9   : > { %s3461_s15 = smov [#allocation17]   ;;  %s3238_s10 = scalar_lea.hbm %s4860_s9, 32 }
  0xda   : > { %s413_s25 = sshll.u32 %s3461_s15, 4  ;;  %p3239_p13 = scmp.ne.s32.totalorder %s4860_s9, %s3238_s10  ;;  %s414_s25 = int_to_ptr.vmem [resolvable:$true] %s413_s25 }
  0xdb   : > { %p3245_p3 = scmp.lt.u32.totalorder %s3238_s10, %s4860_s9 }
  0xdc   : > { %p3241_p0 = pnand %p3239_p13, %p3587_p8 }
  0xde   : > { %p3242_p1 = pneg %p3241_p0 }
  0xe0   : > { %p3247_p2 = pnand %p3245_p3, %p3242_p1 }
  0xe2   : > { %3250 = shalt.err (!%p3247_p2)
}
  0xe3   : > { %s3251_s28 = scalar_lea.vmem %s414_s25, 32  ;;  %p3259_p4 = scmp.lt.s32.totalorder %s414_s25, %s414_s25 }
  0xe4   : > { %p3252_p5 = scmp.ne.s32.totalorder %s414_s25, %s3251_s28  ;;  %p3260_p10 = scmp.lt.s32.totalorder %s3251_s28, %s3251_s28 }
  0xe6   : > { %p3254_p7 = pnand %p3252_p5, %p3587_p8  ;;  %p3261_p11 = por %p3260_p10, %p3259_p4 }
  0xe8   : > { %p3255_p9 = pneg %p3254_p7 }
  0xea   : > { %p3262_p12 = pnand %p3261_p11, %p3255_p9 }
  0xec   : > { %3265 = shalt.err (!%p3262_p12)
}
  0xed   : > { %2893 = dma.hbm_to_vmem [thread:$0]  (!%p3571_p6), %s4860_s9, 32, %s414_s25, [#allocation18]  }
  0xee   : > { %s2424_s16 = sadd.s32 4294967294, %s3448_s20   ;;  %s3760_s27 = sadd.s32 1, %s3448_s20  }
  0xef   : > { %s42_s12 = ssub.s32 %s3448_s20, %s3760_s27  ;;  %s45_s15 = sadd.s32 1, %s3444_s19 }
  0xf0   : > { %p43_p8 = scmp.eq.s32.totalorder %s42_s12, 0  ;;  %p52_p13 = scmp.ne.s32.totalorder %s3444_s19, %s3440_s18 }
  0xf1   : > { %p53_p0 = scmp.eq.s32.totalorder %s3448_s20, 0  ;;  %p58_p1 = scmp.ne.s32.totalorder %s3440_s18, %s3436_s17 }
  0xf2   : > { %s3771_s22 = scalar_select %p43_p8, %s3444_s19, %s45_s15  }
  0xf3   : > { %p3773_p3 = por %p53_p0, %p52_p13  ;;  %p4895_p2 = scmp.eq.s32.totalorder %s3555_s23, 0 }
  0xf4   : > { %p276_p5 = scmp.eq.s32.totalorder %s3555_s23, 1  ;;  %p282_p7 = scmp.eq.s32.totalorder %s2424_s16, 1 }
  0xf5   : > { %p3779_p6 = por %p4895_p2, %p58_p1  ;;  %p2916_p9 = scmp.lt.s32.totalorder %s3448_s20, 2 }
  0xf6   : > { %s3786_s10 = sand.u32 1, %s3444_s19   ;;  %p3788_p4 = por %p276_p5, %p52_p13 }
  0xf7   : > { %p3792_p10 = por %p282_p7, %p58_p1  ;;  %s2435_s24 = sshll.u32 %s3786_s10, 8 }
  0xf8   : > { %s4897_s11 = scalar_select %p3788_p4, 1, 0 }
  0xf9   : > { %s4898_s29 = scalar_select %p3792_p10, 1, 0 }
  0xfa   : > { %s2484_s28 = sshll.u32 %s3448_s20, 12  ;;  %s4899_s0 = sld [smem:[#allocation32_spill]] }
  0xfb   : > { %s428_s12 = scalar_lea.vmem [#allocation2], %s2435_s24  ;;  %p3807_p11 = pnand %p2916_p9, %p3773_p3 }
  0xfc   : > { %s436_s15 = sshll.u32 %s428_s12, 4  ;;  %s2439_s3 = sshll.u32 %s3786_s10, 7  ;;  %s3803_s15 = int_to_ptr.vmem [resolvable:$true] %s436_s15 }
  0xfd   : > { %s425_s2 = scalar_lea.sflag [#allocation3], %s3786_s10  ;;  %p3268_p8 = pneg %p3807_p11 }
 0x100   : > { %s3801_s16 = scalar_lea.hbm %s4899_s0, %s2484_s28  ;;  %s3271_s26 = scalar_lea.hbm %s4899_s0, 8192 }
 0x101   : > { %s3266_s28 = scalar_lea.hbm %s3801_s16, 4096  ;;  %p3272_p1 = scmp.lt.u32.totalorder %s3801_s16, %s4899_s0 }
 0x102   : > { %p3267_p12 = scmp.ne.s32.totalorder %s3801_s16, %s3266_s28  ;;  %p3273_p3 = scmp.lt.u32.totalorder %s3271_s26, %s3266_s28 }
 0x103   : > { %p3275_p5 = scmp.lt.u32.totalorder %s3266_s28, %s3801_s16 }
 0x104   : > { %p3269_p13 = pnand %p3268_p8, %p3267_p12  ;;  %p3274_p2 = por %p3273_p3, %p3272_p1 }
 0x106   : > { %p3270_p0 = pneg %p3269_p13  ;;  %p3276_p7 = por %p3275_p5, %p3274_p2 }
 0x108   : > { %p3277_p9 = pnand %p3276_p7, %p3270_p0 }
 0x10a   : > { %3280 = shalt.err (!%p3277_p9)
}
 0x10b   : > { %s3281_s21 = scalar_lea.vmem %s3803_s15, 4096  ;;  %s3462_s24 = smov [#allocation2]  }
 0x10c   : > { %p3282_p12 = scmp.ne.s32.totalorder %s3803_s15, %s3281_s21  ;;  %s3286_s13 = sshll.u32 %s3462_s24, 4  ;;  %s3287_s13 = int_to_ptr.vmem [resolvable:$false] %s3286_s13 }
 0x10d   : > { %s3288_s4 = scalar_lea.vmem %s3287_s13, 8192  ;;  %p3289_p4 = scmp.lt.s32.totalorder %s3803_s15, %s3287_s13 }
 0x10e   : > { %p3284_p13 = pnand %p3282_p12, %p3268_p8  ;;  %p3290_p1 = scmp.lt.s32.totalorder %s3288_s4, %s3281_s21 }
 0x110   : > { %p3285_p10 = pneg %p3284_p13  ;;  %p3291_p3 = por %p3290_p1, %p3289_p4 }
 0x112   : > { %p3292_p2 = pnand %p3291_p3, %p3285_p10 }
 0x114   : > { %3295 = shalt.err (!%p3292_p2)
}
 0x115   : > { %s4901_s28 = smov 16   ;;  %s4902_s26 = smov 256  }
 0x116   : > { %2897 = dma.hbm_to_vmem [thread:$0]  (!%p3807_p11), %s3801_s16, 4096, %s3803_s15, %s425_s2, %s4902_s26, %s4902_s26, %s4901_s28  }
 0x117   : > { %s2485_s12 = sshll.u32 %s3448_s20, 11  ;;  %s450_s4 = scalar_lea.vmem [#allocation5], %s2439_s3 }
 0x118   : > { %s3848_s13 = scalar_lea.hbm %s4852_s1, %s2485_s12  ;;  %s457_s0 = sshll.u32 %s450_s4, 4  ;;  %s3852_s0 = int_to_ptr.vmem [resolvable:$true] %s457_s0 }
 0x119   : > { %s4903_s5 = sand.u32 1, %s3448_s20   ;;  %s3296_s7 = scalar_lea.hbm %s3848_s13, 2048 }
 0x11a   : > { %s3856_s6 = scalar_lea.sflag [#allocation6], %s4903_s5  ;;  %p3297_p4 = scmp.ne.s32.totalorder %s3848_s13, %s3296_s7 }
 0x11b   : > { %s3301_s10 = scalar_lea.hbm %s4852_s1, 4096  ;;  %p3302_p5 = scmp.lt.u32.totalorder %s3848_s13, %s4852_s1 }
 0x11c   : > { %p3299_p10 = pnand %p3297_p4, %p3268_p8  ;;  %p3303_p7 = scmp.lt.u32.totalorder %s3301_s10, %s3296_s7 }
 0x11d   : > { %p3305_p12 = scmp.lt.u32.totalorder %s3296_s7, %s3848_s13 }
 0x11e   : > { %p3300_p0 = pneg %p3299_p10  ;;  %p3304_p9 = por %p3303_p7, %p3302_p5 }
 0x120   : > { %p3306_p13 = por %p3305_p12, %p3304_p9 }
 0x122   : > { %p3307_p1 = pnand %p3306_p13, %p3300_p0 }
 0x124   : > { %3310 = shalt.err (!%p3307_p1)
}
 0x125   : > { %s3311_s3 = scalar_lea.vmem %s3852_s0, 2048  ;;  %s3463_s5 = smov [#allocation5]  }
 0x126   : > { %p3312_p3 = scmp.ne.s32.totalorder %s3852_s0, %s3311_s3  ;;  %s3316_s26 = sshll.u32 %s3463_s5, 4  ;;  %s3317_s26 = int_to_ptr.vmem [resolvable:$false] %s3316_s26 }
 0x127   : > { %s3318_s12 = scalar_lea.vmem %s3317_s26, 4096  ;;  %p3319_p10 = scmp.lt.s32.totalorder %s3852_s0, %s3317_s26 }
 0x128   : > { %p3314_p2 = pnand %p3312_p3, %p3268_p8  ;;  %p3320_p5 = scmp.lt.s32.totalorder %s3318_s12, %s3311_s3 }
 0x12a   : > { %p3315_p4 = pneg %p3314_p2  ;;  %p3321_p7 = por %p3320_p5, %p3319_p10 }
 0x12c   : > { %p3322_p9 = pnand %p3321_p7, %p3315_p4 }
 0x12e   : > { %3325 = shalt.err (!%p3322_p9)
}
 0x12f   : > { %s4904_s7 = smov 8   ;;  %s4905_s24 = sld [smem:[#allocation31_spill]] }
 0x130   : > { %2900 = dma.hbm_to_vmem [thread:$0]  (!%p3807_p11), %s3848_s13, 2048, %s3852_s0, %s3856_s6, %s4892_s14, %s4892_s14, %s4904_s7  }
 0x135   : > { %p4906_p8 = scmp.ne.s32.totalorder %s4905_s24, 0 }
 0x136   : > { %s3888_s21 = sand.u32 (!%p4906_p8), 1, %s3440_s18  }
 0x137   : > { %469 = sbr.rel (%p4906_p8) target bundleno = 1608 (0x648), region = 60  ;;  %s2443_s4 = sshll.u32 (!%p4906_p8), %s3888_s21, 8 }
 0x138   : > { %s472_s16 = scalar_lea.sflag (!%p4906_p8), [#allocation3], %s3888_s21  ;;  %s3894_s30 = scalar_lea.vmem (!%p4906_p8), [#allocation2], %s2443_s4 }
 0x13e   : > { %3399 = dma.done.wait (%p3779_p6), %s472_s16, 4096  }
 0x13f   : > { %3401 = vsyncadd (%p3779_p6), %s472_s16, 4294963200  ;;  %s480_s0 = sand.u32 1, %s3555_s23   ;;  %s2444_s6 = sshll.u32 %s3888_s21, 7 }
 0x140   : > { %s481_s14 = scalar_lea.sflag [#allocation6], %s480_s0  ;;  %s3904_s13 = scalar_lea.vmem [#allocation5], %s2444_s6 }
 0x141   : > { %3403 = dma.done.wait (%p3779_p6), %s481_s14, 2048  }
 0x142   : > { %3405 = vsyncadd (%p3779_p6), %s481_s14, 4294965248  ;;  %p4907_p11 = scmp.eq.s32.totalorder %s3555_s23, 0 }
 0x144   : > { %3407 = dma.done.wait (%p4907_p11), [#allocation6], 4096   ;;  %p4908_p0 = pmov %p4907_p11 }
 0x146   : > { %3409 = vsyncadd (%p4908_p0), [#allocation6], 4294963200  ;;  %p4909_p12 = pmov %p4908_p0 }
 0x147   : > { %p4910_p13 = pmov %p4908_p0 }
 0x148   : > { %3411 = dma.done.wait (%p4909_p12), [#allocation9], 2064  }
 0x149   : > { %3413 = vsyncadd (%p4910_p13), [#allocation9], 4294965232  ;;  %p4911_p1 = pmov %p4908_p0 }
 0x14a   : > { %p4912_p3 = pmov %p4908_p0 }
 0x14b   : > { %3415 = dma.done.wait (%p4911_p1), [#allocation12], 528  }
 0x14c   : > { %3417 = vsyncadd (%p4912_p3), [#allocation12], 4294966768  ;;  %p4913_p6 = pmov %p4908_p0 }
 0x14d   : > { %p4914_p2 = pmov %p4908_p0 }
 0x14e   : > { %3419 = dma.done.wait (%p4913_p6), [#allocation15], 4112  }
 0x14f   : > { %3421 = vsyncadd (%p4914_p2), [#allocation15], 4294963184  ;;  %p4915_p4 = pmov %p4908_p0 }
 0x150   : > { %p4916_p10 = pmov %p4908_p0 }
 0x151   : > { %3423 = dma.done.wait (%p4915_p4), [#allocation18], 32  }
 0x152   : > { %3425 = vsyncadd (%p4916_p10), [#allocation18], 4294967264  ;;  %v633_v0 = vld [vmem:[#allocation7 + $0x80] sm:$0xff]  ;;  %v634_v1 = vld [vmem:[#allocation7 + $0x88] sm:$0xff]  ;;  %s3464_s25 = smov 32   ;;  %vm1204_vm0 = vcmask 261120  }
 0x153   : > { %v617_v2 = vld [vmem:[#allocation7] sm:$0xff]  ;;  %v2709_v3 = vpack.c.bf16 %v634_v1, %v633_v0  ;;  %v618_v4 = vld [vmem:[#allocation7 + $0x8] sm:$0xff]  ;;  %v635_v5 = vld [vmem:[#allocation7 + $0x90] sm:$0xff]  ;;  %vm2051_vm1 = vcmask 523520   ;;  %s4023_s15 = scalar_lea.vmem [#allocation19], %s2444_s6  ;;  %s3465_s10 = smov 96  }
 0x154   : > { %v636_v6 = vld [vmem:[#allocation7 + $0x98] sm:$0xff]  ;;  %v2711_v7 = vpack.c.bf16 %v618_v4, %v617_v2  ;;  %v619_v9 = vld [vmem:[#allocation7 + $0x10] sm:$0xff]  ;;  %v637_v11 = vld [vmem:[#allocation7 + $0xa0] sm:$0xff]  ;;  %s3466_s2 = smov 64   ;;  %vm2116_vm2 = vcmask 785920   ;;  %s4537_s28 = scalar_lea.vmem [#allocation20], %s2443_s4 }
 0x155   : > { %v2713_v8 = vpack.c.bf16 %v636_v6, %v635_v5  ;;  %v620_v10 = vld [vmem:[#allocation7 + $0x18] sm:$0xff]  ;;  %2710 = vmatprep.subr.bf16.mxu0 %v2709_v3  ;;  %v638_v12 = vld [vmem:[#allocation7 + $0xa8] sm:$0xff]  ;;  %2813 = vmatprep.subr.bf16.mxu1 %v2709_v3  ;;  %v621_v15 = vld [vmem:[#allocation7 + $0x20] sm:$0xff]  ;;  %s2488_s3 = sshll.u32 %s3555_s23, 12  ;;  %s2220_s5 = sshll.u32 %s4537_s28, 4  ;;  %s4643_s5 = int_to_ptr.vmem [resolvable:$true] %s2220_s5 }
 0x156   : > { %2712 = vmatpush3.bf16.msra.mxu0 %v2711_v7  ;;  %v2715_v13 = vpack.c.bf16 %v620_v10, %v619_v9  ;;  %2821 = vmatpush3.bf16.msra.mxu1 %v2711_v7  ;;  %v2717_v14 = vpack.c.bf16 %v638_v12, %v637_v11  ;;  %v622_v16 = vld [vmem:[#allocation7 + $0x28] sm:$0xff]  ;;  %v639_v17 = vld [vmem:[#allocation7 + $0xb0] sm:$0xff]  ;;  %v640_v18 = vld [vmem:[#allocation7 + $0xb8] sm:$0xff]  ;;  %s4917_s7 = sld [smem:[#allocation40_spill]]  ;;  %s2190_s4 = scalar_lea.sflag [#allocation21], %s3888_s21 }
 0x157   : > { %2714 = vmatprep.subr.bf16.mxu0 %v2713_v8  ;;  %2814 = vmatprep.subr.bf16.mxu1 %v2713_v8  ;;  %v2719_v19 = vpack.c.bf16 %v622_v16, %v621_v15  ;;  %v2721_v20 = vpack.c.bf16 %v640_v18, %v639_v17  ;;  %v623_v21 = vld [vmem:[#allocation7 + $0x30] sm:$0xff]  ;;  %v624_v22 = vld [vmem:[#allocation7 + $0x38] sm:$0xff]  ;;  %v641_v23 = vld [vmem:[#allocation7 + $0xc0] sm:$0xff]  ;;  %s3326_s16 = scalar_lea.vmem %s4643_s5, 4096  ;;  %p4918_p7 = scmp.ne.s32.totalorder %s4897_s11, 0 }
 0x158   : > { %v642_v24 = vld [vmem:[#allocation7 + $0xc8] sm:$0xff]  ;;  %v2723_v26 = vpack.c.bf16 %v624_v22, %v623_v21  ;;  %v625_v28 = vld [vmem:[#allocation7 + $0x40] sm:$0xff]  ;;  %v643_v31 = vld [vmem:[#allocation7 + $0xd0] sm:$0xff]  ;;  %p3327_p5 = scmp.ne.s32.totalorder %s4643_s5, %s3326_s16 }
 0x159   : > { %v570_v25 = vld [vmem:[%s3894_s30 + $0x8] sm:$0xff]  ;;  %v2725_v27 = vpack.c.bf16 %v642_v24, %v641_v23  ;;  %v644_v32 = vld [vmem:[#allocation7 + $0xd8] sm:$0xff]  ;;  %v627_v35 = vld [vmem:[#allocation7 + $0x50] sm:$0xff] }
 0x15a   : > { %2716 = vmatpush3.bf16.msra.mxu0 %v2715_v13  ;;  %2822 = vmatpush3.bf16.msra.mxu1 %v2715_v13  ;;  %v626_v29 = vld [vmem:[#allocation7 + $0x48] sm:$0xff]  ;;  %v2729_v34 = vpack.c.bf16 %v644_v32, %v643_v31  ;;  %v628_v36 = vld [vmem:[#allocation7 + $0x58] sm:$0xff]  ;;  %v645_v37 = vld [vmem:[#allocation7 + $0xe0] sm:$0xff]  ;;  %p3328_p9 = pnand %p3327_p5, %p4918_p7 }
 0x15b   : > { %2718 = vmatprep.subr.bf16.mxu0 %v2717_v14  ;;  %2815 = vmatprep.subr.bf16.mxu1 %v2717_v14  ;;  %v586_v30 = vld [vmem:[%s3894_s30 + $0x88] sm:$0xff]  ;;  %v2727_v33 = vpack.c.bf16 %v626_v29, %v625_v28  ;;  %v2731_v39 = vpack.c.bf16 %v628_v36, %v627_v35  ;;  %v629_v41 = vld [vmem:[#allocation7 + $0x60] sm:$0xff]  ;;  %v647_v43 = vld [vmem:[#allocation7 + $0xf0] sm:$0xff] }
 0x15c   : > { %720 = vmatprep.mubr.f32.mxu0 %v570_v25  ;;  %760 = vmatprep.mubr.f32.mxu1 %v586_v30  ;;  %v646_v38 = vld [vmem:[#allocation7 + $0xe8] sm:$0xff]  ;;  %v648_v44 = vld [vmem:[#allocation7 + $0xf8] sm:$0xff]  ;;  %v631_v47 = vld [vmem:[#allocation7 + $0x70] sm:$0xff]  ;;  %s4641_s24 = scalar_lea.hbm %s4917_s7, %s2488_s3  ;;  %p3329_p8 = pneg %p3328_p9 }
 0x15d   : > { %v2733_v40 = vpack.c.bf16 %v646_v38, %v645_v37  ;;  %v630_v42 = vld [vmem:[#allocation7 + $0x68] sm:$0xff]  ;;  %v2737_v46 = vpack.c.bf16 %v648_v44, %v647_v43  ;;  %v632_v48 = vld [vmem:[#allocation7 + $0x78] sm:$0xff]  ;;  %v569_v55 = vld [vmem:[%s3894_s30] sm:$0xff] }
 0x15e   : > { %2720 = vmatpush3.bf16.msra.mxu0 %v2719_v19  ;;  %2823 = vmatpush3.bf16.msra.mxu1 %v2719_v19  ;;  %v2735_v45 = vpack.c.bf16 %v630_v42, %v629_v41  ;;  %v817_v49 = vld [vmem:[#allocation10] sm:$0xff]  ;;  %v818_v50 = vld [vmem:[#allocation10 + $0x8] sm:$0xff]  ;;  %v2739_v51 = vpack.c.bf16 %v632_v48, %v631_v47  ;;  %v819_v53 = vld [vmem:[#allocation10 + $0x10] sm:$0xff] }
 0x15f   : > { %2722 = vmatprep.subr.bf16.mxu0 %v2721_v20  ;;  %2816 = vmatprep.subr.bf16.mxu1 %v2721_v20  ;;  %v2741_v52 = vpack.c.bf16 %v818_v50, %v817_v49  ;;  %v820_v54 = vld [vmem:[#allocation10 + $0x18] sm:$0xff]  ;;  %v821_v60 = vld [vmem:[#allocation10 + $0x20] sm:$0xff]  ;;  %v822_v61 = vld [vmem:[#allocation10 + $0x28] sm:$0xff] }
 0x160   : > { %v585_v56 = vld [vmem:[%s3894_s30 + $0x80] sm:$0xff]  ;;  %v572_v57 = vld [vmem:[%s3894_s30 + $0x18] sm:$0xff]  ;;  %v2745_v59 = vpack.c.bf16 %v820_v54, %v819_v53  ;;  %v571_v62 = vld [vmem:[%s3894_s30 + $0x10] sm:$0xff]  ;;  %v2749_v2 = vpack.c.bf16 %v822_v61, %v821_v60 }
 0x161   : > { %v588_v58 = vld [vmem:[%s3894_s30 + $0x98] sm:$0xff]  ;;  %v587_v63 = vld [vmem:[%s3894_s30 + $0x90] sm:$0xff]  ;;  %v574_v0 = vld [vmem:[%s3894_s30 + $0x28] sm:$0xff] }
 0x162   : > { %2724 = vmatpush3.bf16.msra.mxu0 %v2723_v26  ;;  %2824 = vmatpush3.bf16.msra.mxu1 %v2723_v26  ;;  %v590_v1 = vld [vmem:[%s3894_s30 + $0xa8] sm:$0xff]  ;;  %v823_v3 = vld [vmem:[#allocation10 + $0x30] sm:$0xff]  ;;  %v824_v4 = vld [vmem:[#allocation10 + $0x38] sm:$0xff] }
 0x163   : > { %2726 = vmatprep.subr.bf16.mxu0 %v2725_v27  ;;  %2817 = vmatprep.subr.bf16.mxu1 %v2725_v27  ;;  %v573_v5 = vld [vmem:[%s3894_s30 + $0x20] sm:$0xff]  ;;  %v576_v7 = vld [vmem:[%s3894_s30 + $0x38] sm:$0xff]  ;;  %v2753_v9 = vpack.c.bf16 %v824_v4, %v823_v3  ;;  %v826_v11 = vld [vmem:[#allocation10 + $0x48] sm:$0xff] }
 0x164   : > { %v589_v6 = vld [vmem:[%s3894_s30 + $0xa0] sm:$0xff]  ;;  %v592_v8 = vld [vmem:[%s3894_s30 + $0xb8] sm:$0xff]  ;;  %v575_v12 = vld [vmem:[%s3894_s30 + $0x30] sm:$0xff] }
 0x165   : > { %v825_v10 = vld [vmem:[#allocation10 + $0x40] sm:$0xff]  ;;  %v591_v13 = vld [vmem:[%s3894_s30 + $0xb0] sm:$0xff]  ;;  %v828_v18 = vld [vmem:[#allocation10 + $0x58] sm:$0xff] }
 0x166   : > { %2728 = vmatpush3.bf16.msra.mxu0 %v2727_v33  ;;  %2825 = vmatpush3.bf16.msra.mxu1 %v2727_v33  ;;  %v578_v14 = vld [vmem:[%s3894_s30 + $0x48] sm:$0xff]  ;;  %v2757_v16 = vpack.c.bf16 %v826_v11, %v825_v10  ;;  %v827_v17 = vld [vmem:[#allocation10 + $0x50] sm:$0xff]  ;;  %v577_v19 = vld [vmem:[%s3894_s30 + $0x40] sm:$0xff] }
 0x167   : > { %2730 = vmatprep.subr.bf16.mxu0 %v2729_v34  ;;  %2818 = vmatprep.subr.bf16.mxu1 %v2729_v34  ;;  %v594_v15 = vld [vmem:[%s3894_s30 + $0xc8] sm:$0xff]  ;;  %v593_v20 = vld [vmem:[%s3894_s30 + $0xc0] sm:$0xff]  ;;  %v580_v21 = vld [vmem:[%s3894_s30 + $0x58] sm:$0xff]  ;;  %v2761_v23 = vpack.c.bf16 %v828_v18, %v827_v17 }
 0x168   : > { %v596_v22 = vld [vmem:[%s3894_s30 + $0xd8] sm:$0xff]  ;;  %v579_v24 = vld [vmem:[%s3894_s30 + $0x50] sm:$0xff]  ;;  %v582_v26 = vld [vmem:[%s3894_s30 + $0x68] sm:$0xff] }
 0x169   : > { %v595_v25 = vld [vmem:[%s3894_s30 + $0xd0] sm:$0xff]  ;;  %v598_v27 = vld [vmem:[%s3894_s30 + $0xe8] sm:$0xff]  ;;  %v581_v28 = vld [vmem:[%s3894_s30 + $0x60] sm:$0xff] }
 0x16a   : > { %2732 = vmatpush3.bf16.msra.mxu0 %v2731_v39  ;;  %2826 = vmatpush3.bf16.msra.mxu1 %v2731_v39  ;;  %v597_v29 = vld [vmem:[%s3894_s30 + $0xe0] sm:$0xff]  ;;  %v584_v30 = vld [vmem:[%s3894_s30 + $0x78] sm:$0xff]  ;;  %v583_v32 = vld [vmem:[%s3894_s30 + $0x70] sm:$0xff] }
 0x16b   : > { %2734 = vmatprep.subr.bf16.mxu0 %v2733_v40  ;;  %2819 = vmatprep.subr.bf16.mxu1 %v2733_v40  ;;  %v600_v31 = vld [vmem:[%s3894_s30 + $0xf8] sm:$0xff]  ;;  %v599_v33 = vld [vmem:[%s3894_s30 + $0xf0] sm:$0xff]  ;;  %v829_v34 = vld [vmem:[#allocation10 + $0x60] sm:$0xff] }
 0x16c   : > { %v830_v35 = vld [vmem:[#allocation10 + $0x68] sm:$0xff]  ;;  %v831_v37 = vld [vmem:[#allocation10 + $0x70] sm:$0xff]  ;;  %v832_v38 = vld [vmem:[#allocation10 + $0x78] sm:$0xff] }
 0x16d   : > { %v2765_v36 = vpack.c.bf16 %v830_v35, %v829_v34  ;;  %v2769_v39 = vpack.c.bf16 %v832_v38, %v831_v37  ;;  %v601_v40 = vld [vmem:[%s3904_s13] sm:$0xff]  ;;  %v603_v41 = vld [vmem:[%s3904_s13 + $0x10] sm:$0xff]  ;;  %v602_v42 = vld [vmem:[%s3904_s13 + $0x8] sm:$0xff] }
 0x16e   : > { %2736 = vmatpush3.bf16.msra.mxu0 %v2735_v45  ;;  %2827 = vmatpush3.bf16.msra.mxu1 %v2735_v45  ;;  %v604_v43 = vld [vmem:[%s3904_s13 + $0x18] sm:$0xff]  ;;  %v606_v44 = vld [vmem:[%s3904_s13 + $0x28] sm:$0xff]  ;;  %v605_v45 = vld [vmem:[%s3904_s13 + $0x20] sm:$0xff] }
 0x16f   : > { %2738 = vmatprep.subr.bf16.mxu0 %v2737_v46  ;;  %2820 = vmatprep.subr.bf16.mxu1 %v2737_v46  ;;  %v608_v46 = vld [vmem:[%s3904_s13 + $0x38] sm:$0xff]  ;;  %v607_v47 = vld [vmem:[%s3904_s13 + $0x30] sm:$0xff]  ;;  %v610_v48 = vld [vmem:[%s3904_s13 + $0x48] sm:$0xff] }
 0x170   : > { %1049 = vrot.lane.b32.xlu0 %v601_v40, %s3464_s25  ;;  %1053 = vrot.lane.b32.xlu1 %v603_v41, %s3464_s25  ;;  %v609_v49 = vld [vmem:[%s3904_s13 + $0x40] sm:$0xff]  ;;  %v612_v50 = vld [vmem:[%s3904_s13 + $0x58] sm:$0xff] }
 0x171   : > { %v613_v53 = vld [vmem:[%s3904_s13 + $0x60] sm:$0xff]  ;;  %v616_v54 = vld [vmem:[%s3904_s13 + $0x78] sm:$0xff] }
 0x172   : > { %2740 = vmatpush3.bf16.msra.mxu0 %v2739_v51  ;;  %2828 = vmatpush3.bf16.msra.mxu1 %v2739_v51  ;;  %v611_v51 = vld [vmem:[%s3904_s13 + $0x50] sm:$0xff] }
 0x173   : > { %2742 = vmatprep.subr.bf16.mxu1 %v2741_v52 }
 0x174   : > { %1051 = vrot.lane.b32.xlu0 %v602_v42, %s3464_s25  ;;  %1055 = vrot.lane.b32.xlu1 %v604_v43, %s3464_s25 }
 0x175   : > { %721 = vmatmul.mubr.f32.vlgmr.msra.gmra.mrb[0].mxu0 %v569_v55  ;;  %761 = vmatmul.mubr.f32.vlgmr.msra.gmra.mrb[0].mxu1 %v585_v56  ;;  %v615_v55 = vld [vmem:[%s3904_s13 + $0x70] sm:$0xff] }
 0x176   : > { %725 = vmatprep.mubr.f32.mxu0 %v572_v57  ;;  %765 = vmatprep.mubr.f32.mxu1 %v588_v58  ;;  %v3994_v58 = vld [vmem:[#allocation8] ss:$0 sm:$0xff] }
 0x177   : > { %2744 = vmatpush3.bf16.msra.mxu1 %v2741_v52  ;;  %v614_v52 = vld [vmem:[%s3904_s13 + $0x68] sm:$0xff] }
 0x178   : > { %2746 = vmatprep.subr.bf16.mxu1 %v2745_v59  ;;  %1059 = vrot.lane.b32.xlu1 %v606_v44, %s3464_s25 }
 0x179   : > { %726 = vmatmul.mubr.f32.gmra.mrb[2].mxu0 %v571_v62  ;;  %766 = vmatmul.mubr.f32.gmra.mrb[2].mxu1 %v587_v63 }
 0x17a   : > { %730 = vmatprep.mubr.f32.mxu0 %v574_v0  ;;  %770 = vmatprep.mubr.f32.mxu1 %v590_v1 }
 0x17b   : > { %2748 = vmatpush3.bf16.msra.mxu1 %v2745_v59  ;;  %1057 = vrot.lane.b32.xlu0 %v605_v45, %s3464_s25 }
 0x17c   : > { %2750 = vmatprep.subr.bf16.mxu1 %v2749_v2  ;;  %1063 = vrot.lane.b32.xlu1 %v608_v46, %s3464_s25 }
 0x17d   : > { %731 = vmatmul.mubr.f32.gmra.mrb[4].mxu0 %v573_v5  ;;  %771 = vmatmul.mubr.f32.gmra.mrb[4].mxu1 %v589_v6 }
 0x17e   : > { %735 = vmatprep.mubr.f32.mxu0 %v576_v7  ;;  %775 = vmatprep.mubr.f32.mxu1 %v592_v8 }
 0x17f   : > { %2752 = vmatpush3.bf16.msra.mxu1 %v2749_v2  ;;  %1061 = vrot.lane.b32.xlu0 %v607_v47, %s3464_s25 }
 0x180   : > { %2754 = vmatprep.subr.bf16.mxu1 %v2753_v9  ;;  %1067 = vrot.lane.b32.xlu1 %v610_v48, %s3464_s25 }
 0x181   : > { %736 = vmatmul.mubr.f32.gmra.mrb[6].mxu0 %v575_v12  ;;  %776 = vmatmul.mubr.f32.gmra.mrb[6].mxu1 %v591_v13 }
 0x182   : > { %740 = vmatprep.mubr.f32.mxu0 %v578_v14  ;;  %780 = vmatprep.mubr.f32.mxu1 %v594_v15 }
 0x183   : > { %2756 = vmatpush3.bf16.msra.mxu1 %v2753_v9  ;;  %1065 = vrot.lane.b32.xlu0 %v609_v49, %s3464_s25 }
 0x184   : > { %2758 = vmatprep.subr.bf16.mxu1 %v2757_v16  ;;  %1071 = vrot.lane.b32.xlu1 %v612_v50, %s3464_s25 }
 0x185   : > { %741 = vmatmul.mubr.f32.gmra.mrb[8].mxu0 %v577_v19  ;;  %781 = vmatmul.mubr.f32.gmra.mrb[8].mxu1 %v593_v20 }
 0x186   : > { %745 = vmatprep.mubr.f32.mxu0 %v580_v21  ;;  %785 = vmatprep.mubr.f32.mxu1 %v596_v22 }
 0x187   : > { %2760 = vmatpush3.bf16.msra.mxu1 %v2757_v16  ;;  %1069 = vrot.lane.b32.xlu0 %v611_v51, %s3464_s25 }
 0x188   : > { %2762 = vmatprep.subr.bf16.mxu1 %v2761_v23  ;;  %1075 = vrot.lane.b32.xlu1 %v614_v52, %s3464_s25 }
 0x189   : > { %746 = vmatmul.mubr.f32.gmra.mrb[10].mxu0 %v579_v24  ;;  %786 = vmatmul.mubr.f32.gmra.mrb[10].mxu1 %v595_v25 }
 0x18a   : > { %750 = vmatprep.mubr.f32.mxu0 %v582_v26  ;;  %790 = vmatprep.mubr.f32.mxu1 %v598_v27 }
 0x18b   : > { %2764 = vmatpush3.bf16.msra.mxu1 %v2761_v23  ;;  %1073 = vrot.lane.b32.xlu0 %v613_v53, %s3464_s25 }
 0x18c   : > { %2766 = vmatprep.subr.bf16.mxu1 %v2765_v36  ;;  %1079 = vrot.lane.b32.xlu1 %v616_v54, %s3464_s25 }
 0x18d   : > { %751 = vmatmul.mubr.f32.gmra.mrb[12].mxu0 %v581_v28  ;;  %791 = vmatmul.mubr.f32.gmra.mrb[12].mxu1 %v597_v29 }
 0x18e   : > { %755 = vmatprep.mubr.f32.mxu0 %v584_v30  ;;  %795 = vmatprep.mubr.f32.mxu1 %v600_v31 }
 0x18f   : > { %2768 = vmatpush3.bf16.msra.mxu1 %v2765_v36  ;;  %1077 = vrot.lane.b32.xlu0 %v615_v55, %s3464_s25 }
 0x190   : > { %2770 = vmatprep.subr.bf16.mxu1 %v2769_v39 }
 0x191   : > { %756 = vmatmul.mubr.f32.gmra.mrb[14].mxu0 %v583_v32  ;;  %796 = vmatmul.mubr.f32.gmra.mrb[14].mxu1 %v599_v33 }
 0x193   : > { %2772 = vmatpush3.bf16.msra.mxu1 %v2769_v39 }
 0x248   : > { %v2521_v56 = vpop.f32.mrb[0].mxu0  ;;  %v2545_v57 = vpop.f32.mrb[0].mxu1 }
 0x249   : > { %v2522_v59 = vpop.f32.mrb[1].mxu0  ;;  %v2546_v60 = vpop.f32.mrb[1].mxu1 }
 0x24a   : > { %v2523_v61 = vadd.f32 %v2522_v59, %v2521_v56  ;;  %v2547_v62 = vadd.f32 %v2546_v60, %v2545_v57 }
 0x24c   : > { %v723_v63 = vadd.f32 %v2523_v61, %v3994_v58  ;;  %v2524_v0 = vpop.f32.mrb[2].mxu0  ;;  %v2548_v1 = vpop.f32.mrb[2].mxu1  ;;  %v763_v51 = vadd.f32 %v2547_v62, %v3994_v58 }
 0x24d   : > { %v2525_v2 = vpop.f32.mrb[3].mxu0  ;;  %v2549_v3 = vpop.f32.mrb[3].mxu1 }
 0x24e   : > { %v801_v4 = vmax.f32 %v723_v63, 0.0  ;;  %v2526_v5 = vadd.f32 %v2525_v2, %v2524_v0  ;;  %v2550_v6 = vadd.f32 %v2549_v3, %v2548_v1  ;;  %v809_v59 = vmax.f32 %v763_v51, 0.0 }
 0x250   : > { %v728_v7 = vadd.f32 %v2526_v5, %v3994_v58  ;;  %v2527_v8 = vpop.f32.mrb[4].mxu0  ;;  %2653 = vmatprep.mubr.f32.mxu1 %v801_v4  ;;  %v2551_v9 = vpop.f32.mrb[4].mxu1  ;;  %v768_v57 = vadd.f32 %v2550_v6, %v3994_v58 }
 0x251   : > { %v2528_v10 = vpop.f32.mrb[5].mxu0  ;;  %v2552_v11 = vpop.f32.mrb[5].mxu1 }
 0x252   : > { %v802_v12 = vmax.f32 %v728_v7, 0.0  ;;  %v2529_v13 = vadd.f32 %v2528_v10, %v2527_v8  ;;  %v2553_v14 = vadd.f32 %v2552_v11, %v2551_v9  ;;  %v810_v63 = vmax.f32 %v768_v57, 0.0  ;;  %v1193_v10 = vld [vmem:[#allocation13] sm:$0xff]  ;;  %v1194_v11 = vld [vmem:[#allocation13 + $0x8] sm:$0xff] }
 0x254   : > { %v733_v15 = vadd.f32 %v2529_v13, %v3994_v58  ;;  %v2530_v16 = vpop.f32.mrb[6].mxu0  ;;  %2654 = vmatmul.mubr.f32.vlgmr.msra.gmra.mrb[16].mxu1 %v802_v12  ;;  %v2554_v17 = vpop.f32.mrb[6].mxu1  ;;  %v773_v60 = vadd.f32 %v2553_v14, %v3994_v58  ;;  %v2773_v12 = vpack.c.bf16 %v1194_v11, %v1193_v10  ;;  %v1195_v13 = vld [vmem:[#allocation13 + $0x10] sm:$0xff]  ;;  %v1196_v14 = vld [vmem:[#allocation13 + $0x18] sm:$0xff] }
 0x255   : > { %v2531_v18 = vpop.f32.mrb[7].mxu0  ;;  %v2555_v19 = vpop.f32.mrb[7].mxu1 }
 0x256   : > { %v803_v20 = vmax.f32 %v733_v15, 0.0  ;;  %v2532_v21 = vadd.f32 %v2531_v18, %v2530_v16  ;;  %v2556_v22 = vadd.f32 %v2555_v19, %v2554_v17  ;;  %v811_v1 = vmax.f32 %v773_v60, 0.0  ;;  %2774 = vmatprep.subr.bf16.mxu1 %v2773_v12  ;;  %v4012_v16 = vld [vmem:[#allocation11] ss:$0 sm:$0xff] }
 0x257   : > { %2776 = vmatpush3.bf16.msra.mxu1 %v2773_v12  ;;  %v2777_v15 = vpack.c.bf16 %v1196_v14, %v1195_v13 }
 0x258   : > { %v738_v23 = vadd.f32 %v2532_v21, %v3994_v58  ;;  %v2533_v24 = vpop.f32.mrb[8].mxu0  ;;  %2656 = vmatprep.mubr.f32.mxu1 %v803_v20  ;;  %v2557_v25 = vpop.f32.mrb[8].mxu1  ;;  %v778_v0 = vadd.f32 %v2556_v22, %v3994_v58 }
 0x259   : > { %v2534_v26 = vpop.f32.mrb[9].mxu0  ;;  %v2558_v27 = vpop.f32.mrb[9].mxu1  ;;  %2778 = vmatprep.subr.bf16.mxu1 %v2777_v15 }
 0x25a   : > { %v804_v28 = vmax.f32 %v738_v23, 0.0  ;;  %v2535_v29 = vadd.f32 %v2534_v26, %v2533_v24  ;;  %v2559_v30 = vadd.f32 %v2558_v27, %v2557_v25  ;;  %v812_v2 = vmax.f32 %v778_v0, 0.0  ;;  %v1050_v27 = vpop.permute.xlu0 %1049 }
 0x25b   : > { %2780 = vmatpush3.bf16.msra.mxu1 %v2777_v15 }
 0x25c   : > { %v743_v31 = vadd.f32 %v2535_v29, %v3994_v58  ;;  %v2536_v32 = vpop.f32.mrb[10].mxu0  ;;  %2657 = vmatmul.mubr.f32.gmra.mrb[18].mxu1 %v804_v28  ;;  %v2560_v33 = vpop.f32.mrb[10].mxu1  ;;  %v783_v62 = vadd.f32 %v2559_v30, %v3994_v58 }
 0x25d   : > { %v2537_v34 = vpop.f32.mrb[11].mxu0  ;;  %v2561_v35 = vpop.f32.mrb[11].mxu1 }
 0x25e   : > { %v805_v36 = vmax.f32 %v743_v31, 0.0  ;;  %v2538_v37 = vadd.f32 %v2537_v34, %v2536_v32  ;;  %v2562_v38 = vadd.f32 %v2561_v35, %v2560_v33  ;;  %v813_v4 = vmax.f32 %v783_v62, 0.0  ;;  %v1052_v33 = vpop.permute.xlu0 %1051 }
 0x260   : > { %v748_v39 = vadd.f32 %v2538_v37, %v3994_v58  ;;  %v2539_v40 = vpop.f32.mrb[12].mxu0  ;;  %2659 = vmatprep.mubr.f32.mxu1 %v805_v36  ;;  %v2563_v41 = vpop.f32.mrb[12].mxu1  ;;  %v788_v3 = vadd.f32 %v2562_v38, %v3994_v58 }
 0x261   : > { %v2540_v42 = vpop.f32.mrb[13].mxu0  ;;  %v2564_v43 = vpop.f32.mrb[13].mxu1 }
 0x262   : > { %v806_v44 = vmax.f32 %v748_v39, 0.0  ;;  %v2541_v45 = vadd.f32 %v2540_v42, %v2539_v40  ;;  %v2565_v46 = vadd.f32 %v2564_v43, %v2563_v41  ;;  %v814_v6 = vmax.f32 %v788_v3, 0.0  ;;  %v1054_v38 = vpop.permute.xlu1 %1053  ;;  %v1058_v60 = vpop.permute.xlu0 %1057 }
 0x264   : > { %v753_v47 = vadd.f32 %v2541_v45, %v3994_v58  ;;  %v2542_v48 = vpop.f32.mrb[14].mxu0  ;;  %2660 = vmatmul.mubr.f32.gmra.mrb[20].mxu1 %v806_v44  ;;  %v2566_v49 = vpop.f32.mrb[14].mxu1  ;;  %v793_v5 = vadd.f32 %v2565_v46, %v3994_v58 }
 0x265   : > { %v2543_v50 = vpop.f32.mrb[15].mxu0  ;;  %v2567_v52 = vpop.f32.mrb[15].mxu1 }
 0x266   : > { %v807_v53 = vmax.f32 %v753_v47, 0.0  ;;  %v2544_v54 = vadd.f32 %v2543_v50, %v2542_v48  ;;  %v2568_v55 = vadd.f32 %v2567_v52, %v2566_v49  ;;  %v815_v8 = vmax.f32 %v793_v5, 0.0  ;;  %v1056_v47 = vpop.permute.xlu1 %1055 }
 0x268   : > { %v758_v56 = vadd.f32 %v2544_v54, %v3994_v58  ;;  %2662 = vmatprep.mubr.f32.mxu1 %v807_v53  ;;  %v798_v7 = vadd.f32 %v2568_v55, %v3994_v58 }
 0x26a   : > { %v808_v61 = vmax.f32 %v758_v56, 0.0  ;;  %v816_v9 = vmax.f32 %v798_v7, 0.0  ;;  %v1060_v56 = vpop.permute.xlu1 %1059 }
 0x26c   : > { %2663 = vmatmul.mubr.f32.gmra.mrb[22].mxu1 %v808_v61 }
 0x26d   : > { %2665 = vmatprep.mubr.f32.mxu1 %v809_v59 }
 0x26e   : > { %v1064_v3 = vpop.permute.xlu1 %1063 }
 0x270   : > { %2666 = vmatmul.mubr.f32.gmra.mrb[24].mxu1 %v810_v63 }
 0x271   : > { %2668 = vmatprep.mubr.f32.mxu1 %v811_v1 }
 0x274   : > { %2669 = vmatmul.mubr.f32.gmra.mrb[26].mxu1 %v812_v2 }
 0x275   : > { %2671 = vmatprep.mubr.f32.mxu1 %v813_v4 }
 0x278   : > { %2672 = vmatmul.mubr.f32.gmra.mrb[28].mxu1 %v814_v6  ;;  %v1062_v6 = vpop.permute.xlu0 %1061 }
 0x279   : > { %2674 = vmatprep.mubr.f32.mxu1 %v815_v8 }
 0x27c   : > { %2675 = vmatmul.mubr.f32.gmra.mrb[30].mxu1 %v816_v9 }
 0x327   : > { %v2655_v58 = vpop.f32.mrb[16].mxu1 }
 0x328   : > { %v4015_v17 = vadd.f32 %v2655_v58, %v4012_v16  ;;  %v906_v18 = vpop.f32.mrb[17].mxu1 }
 0x329   : > { %v4018_v19 = vadd.f32 %v4012_v16, %v906_v18 }
 0x32a   : > { %v986_v20 = vmul.f32 0.5, %v4015_v17  ;;  %2036 = vst.msk [vmem:[%s4023_s15 + $0x8] sm:$0xff] %vm1204_vm0, %v4015_v17 }
 0x32b   : > { %v985_v21 = vmul.f32 0.5, %v4018_v19  ;;  %2035 = vst.msk [vmem:[%s4023_s15] sm:$0xff] %vm1204_vm0, %v4018_v19 }
 0x32c   : > { %2053 = vst.msk [vmem:[%s4023_s15 + $0x8] sm:$0xff] %vm2051_vm1, %v4015_v17  ;;  %v1003_v22 = vmul.f32 1.442695, %v986_v20  ;;  %2052 = vst.msk [vmem:[%s4023_s15] sm:$0xff] %vm2051_vm1, %v4018_v19 }
 0x32d   : > { %v1001_v23 = vmul.f32 1.442695, %v985_v21 }
 0x32e   : > { %2978 = vpow2.f32 %v1003_v22 }
 0x32f   : > { %v2658_v24 = vpop.f32.mrb[18].mxu1  ;;  %2980 = vpow2.f32 %v1001_v23 }
 0x330   : > { %v4039_v25 = vadd.f32 %v2658_v24, %v4012_v16  ;;  %v916_v26 = vpop.f32.mrb[19].mxu1  ;;  %v1068_v24 = vpop.permute.xlu1 %1067 }
 0x331   : > { %v4042_v28 = vadd.f32 %v4012_v16, %v916_v26 }
 0x332   : > { %v988_v29 = vmul.f32 0.5, %v4039_v25  ;;  %2038 = vst.msk [vmem:[%s4023_s15 + $0x18] sm:$0xff] %vm1204_vm0, %v4039_v25 }
 0x333   : > { %v987_v30 = vmul.f32 0.5, %v4042_v28  ;;  %2037 = vst.msk [vmem:[%s4023_s15 + $0x10] sm:$0xff] %vm1204_vm0, %v4042_v28 }
 0x334   : > { %2055 = vst.msk [vmem:[%s4023_s15 + $0x18] sm:$0xff] %vm2051_vm1, %v4039_v25  ;;  %v1007_v31 = vmul.f32 1.442695, %v988_v29  ;;  %2054 = vst.msk [vmem:[%s4023_s15 + $0x10] sm:$0xff] %vm2051_vm1, %v4042_v28  ;;  %v1066_v29 = vpop.permute.xlu0 %1065 }
 0x335   : > { %v1005_v32 = vmul.f32 1.442695, %v987_v30 }
 0x336   : > { %2982 = vpow2.f32 %v1007_v31 }
 0x337   : > { %v2661_v34 = vpop.f32.mrb[20].mxu1  ;;  %2984 = vpow2.f32 %v1005_v32 }
 0x338   : > { %v4058_v35 = vpop.eup %2978  ;;  %v4061_v36 = vadd.f32 %v2661_v34, %v4012_v16  ;;  %v926_v37 = vpop.f32.mrb[21].mxu1 }
 0x339   : > { %v4063_v39 = vpop.eup %2980  ;;  %v1098_v40 = vmul.f32 %v4058_v35, %v1052_v33  ;;  %v4067_v41 = vadd.f32 %v4012_v16, %v926_v37 }
 0x33a   : > { %v1097_v42 = vmul.f32 %v4063_v39, %v1050_v27  ;;  %v990_v43 = vmul.f32 0.5, %v4061_v36  ;;  %2040 = vst.msk [vmem:[%s4023_s15 + $0x28] sm:$0xff] %vm1204_vm0, %v4061_v36 }
 0x33b   : > { %1131 = vrot.lane.b32.xlu1 %v1098_v40, %s3465_s10  ;;  %v989_v44 = vmul.f32 0.5, %v4067_v41  ;;  %2039 = vst.msk [vmem:[%s4023_s15 + $0x20] sm:$0xff] %vm1204_vm0, %v4067_v41 }
 0x33c   : > { %2057 = vst.msk [vmem:[%s4023_s15 + $0x28] sm:$0xff] %vm2051_vm1, %v4061_v36  ;;  %1129 = vrot.lane.b32.xlu0 %v1097_v42, %s3465_s10  ;;  %v1011_v45 = vmul.f32 1.442695, %v990_v43  ;;  %2056 = vst.msk [vmem:[%s4023_s15 + $0x20] sm:$0xff] %vm2051_vm1, %v4067_v41 }
 0x33d   : > { %v1009_v46 = vmul.f32 1.442695, %v989_v44 }
 0x33e   : > { %2986 = vpow2.f32 %v1011_v45 }
 0x33f   : > { %v2664_v48 = vpop.f32.mrb[22].mxu1  ;;  %2988 = vpow2.f32 %v1009_v46 }
 0x340   : > { %v4086_v49 = vpop.eup %2982  ;;  %v4089_v50 = vadd.f32 %v2664_v48, %v4012_v16  ;;  %v936_v51 = vpop.f32.mrb[23].mxu1 }
 0x341   : > { %v4091_v52 = vpop.eup %2984  ;;  %v1100_v53 = vmul.f32 %v4086_v49, %v1056_v47  ;;  %v4095_v54 = vadd.f32 %v4012_v16, %v936_v51  ;;  %v1072_v47 = vpop.permute.xlu1 %1071 }
 0x342   : > { %v1099_v55 = vmul.f32 %v4091_v52, %v1054_v38  ;;  %v992_v57 = vmul.f32 0.5, %v4089_v50  ;;  %2042 = vst.msk [vmem:[%s4023_s15 + $0x38] sm:$0xff] %vm1204_vm0, %v4089_v50  ;;  %v1070_v51 = vpop.permute.xlu0 %1069 }
 0x343   : > { %1135 = vrot.lane.b32.xlu1 %v1100_v53, %s3465_s10  ;;  %v2667_v59 = vpop.f32.mrb[24].mxu1  ;;  %v991_v61 = vmul.f32 0.5, %v4095_v54  ;;  %2041 = vst.msk [vmem:[%s4023_s15 + $0x30] sm:$0xff] %vm1204_vm0, %v4095_v54 }
 0x344   : > { %2059 = vst.msk [vmem:[%s4023_s15 + $0x38] sm:$0xff] %vm2051_vm1, %v4089_v50  ;;  %v4111_v63 = vadd.f32 %v2667_v59, %v4012_v16  ;;  %v946_v0 = vpop.f32.mrb[25].mxu1  ;;  %1133 = vrot.lane.b32.xlu0 %v1099_v55, %s3465_s10  ;;  %v1015_v1 = vmul.f32 1.442695, %v992_v57  ;;  %2058 = vst.msk [vmem:[%s4023_s15 + $0x30] sm:$0xff] %vm2051_vm1, %v4095_v54 }
 0x345   : > { %v4118_v62 = vadd.f32 %v4012_v16, %v946_v0  ;;  %v1013_v2 = vmul.f32 1.442695, %v991_v61  ;;  %v1076_v0 = vpop.permute.xlu1 %1075 }
 0x346   : > { %2990 = vpow2.f32 %v1015_v1  ;;  %v994_v4 = vmul.f32 0.5, %v4111_v63  ;;  %2044 = vst.msk [vmem:[%s4023_s15 + $0x48] sm:$0xff] %vm1204_vm0, %v4111_v63 }
 0x347   : > { %v2670_v5 = vpop.f32.mrb[26].mxu1  ;;  %2992 = vpow2.f32 %v1013_v2  ;;  %v993_v7 = vmul.f32 0.5, %v4118_v62  ;;  %2043 = vst.msk [vmem:[%s4023_s15 + $0x40] sm:$0xff] %vm1204_vm0, %v4118_v62 }
 0x348   : > { %2061 = vst.msk [vmem:[%s4023_s15 + $0x48] sm:$0xff] %vm2051_vm1, %v4111_v63  ;;  %v4131_v8 = vpop.eup %2986  ;;  %v4134_v9 = vadd.f32 %v2670_v5, %v4012_v16  ;;  %v956_v10 = vpop.f32.mrb[27].mxu1  ;;  %v1019_v11 = vmul.f32 1.442695, %v994_v4  ;;  %2060 = vst.msk [vmem:[%s4023_s15 + $0x40] sm:$0xff] %vm2051_vm1, %v4118_v62 }
 0x349   : > { %v4139_v12 = vpop.eup %2988  ;;  %v1102_v13 = vmul.f32 %v4131_v8, %v1060_v56  ;;  %v4143_v14 = vadd.f32 %v4012_v16, %v956_v10  ;;  %v1017_v15 = vmul.f32 1.442695, %v993_v7 }
 0x34a   : > { %v1101_v58 = vmul.f32 %v4139_v12, %v1058_v60  ;;  %2994 = vpow2.f32 %v1019_v11  ;;  %v996_v18 = vmul.f32 0.5, %v4134_v9  ;;  %2046 = vst.msk [vmem:[%s4023_s15 + $0x58] sm:$0xff] %vm1204_vm0, %v4134_v9  ;;  %v1080_v11 = vpop.permute.xlu1 %1079 }
 0x34b   : > { %1139 = vrot.lane.b32.xlu1 %v1102_v13, %s3465_s10  ;;  %v2673_v20 = vpop.f32.mrb[28].mxu1  ;;  %2996 = vpow2.f32 %v1017_v15  ;;  %v995_v21 = vmul.f32 0.5, %v4143_v14  ;;  %2045 = vst.msk [vmem:[%s4023_s15 + $0x50] sm:$0xff] %vm1204_vm0, %v4143_v14 }
 0x34c   : > { %2063 = vst.msk [vmem:[%s4023_s15 + $0x58] sm:$0xff] %vm2051_vm1, %v4134_v9  ;;  %v4159_v22 = vadd.f32 %v2673_v20, %v4012_v16  ;;  %v966_v23 = vpop.f32.mrb[29].mxu1  ;;  %1137 = vrot.lane.b32.xlu0 %v1101_v58, %s3465_s10  ;;  %v1023_v26 = vmul.f32 1.442695, %v996_v18  ;;  %2062 = vst.msk [vmem:[%s4023_s15 + $0x50] sm:$0xff] %vm2051_vm1, %v4143_v14 }
 0x34d   : > { %v4166_v27 = vadd.f32 %v4012_v16, %v966_v23  ;;  %v1021_v30 = vmul.f32 1.442695, %v995_v21  ;;  %v1747_v21 = vmul.f32 %v4018_v19, %v4018_v19  ;;  %v1755_v23 = vmul.f32 %v4118_v62, %v4118_v62 }
 0x34e   : > { %2998 = vpow2.f32 %v1023_v26  ;;  %v998_v31 = vmul.f32 0.5, %v4159_v22  ;;  %2048 = vst.msk [vmem:[%s4023_s15 + $0x68] sm:$0xff] %vm1204_vm0, %v4159_v22 }
 0x34f   : > { %v2676_v32 = vpop.f32.mrb[30].mxu1  ;;  %3000 = vpow2.f32 %v1021_v30  ;;  %v997_v33 = vmul.f32 0.5, %v4166_v27  ;;  %2047 = vst.msk [vmem:[%s4023_s15 + $0x60] sm:$0xff] %vm1204_vm0, %v4166_v27  ;;  %v1750_v30 = vmul.f32 %v4039_v25, %v4039_v25 }
 0x350   : > { %2065 = vst.msk [vmem:[%s4023_s15 + $0x68] sm:$0xff] %vm2051_vm1, %v4159_v22  ;;  %v4179_v34 = vpop.eup %2990  ;;  %v4182_v37 = vadd.f32 %v2676_v32, %v4012_v16  ;;  %v976_v38 = vpop.f32.mrb[31].mxu1  ;;  %v1027_v40 = vmul.f32 1.442695, %v998_v31  ;;  %2064 = vst.msk [vmem:[%s4023_s15 + $0x60] sm:$0xff] %vm2051_vm1, %v4166_v27  ;;  %v1751_v31 = vmul.f32 %v4067_v41, %v4067_v41  ;;  %v1752_v32 = vmul.f32 %v4061_v36, %v4061_v36 }
 0x351   : > { %v4187_v42 = vpop.eup %2992  ;;  %v1104_v43 = vmul.f32 %v4179_v34, %v1064_v3  ;;  %v4191_v44 = vadd.f32 %v4012_v16, %v976_v38  ;;  %v1025_v45 = vmul.f32 1.442695, %v997_v33  ;;  %v1074_v3 = vpop.permute.xlu0 %1073  ;;  %v1753_v33 = vmul.f32 %v4095_v54, %v4095_v54 }
 0x352   : > { %v1103_v46 = vmul.f32 %v4187_v42, %v1062_v6  ;;  %3002 = vpow2.f32 %v1027_v40  ;;  %v1000_v48 = vmul.f32 0.5, %v4182_v37  ;;  %2050 = vst.msk [vmem:[%s4023_s15 + $0x78] sm:$0xff] %vm1204_vm0, %v4182_v37  ;;  %v1762_v26 = vmul.f32 %v4182_v37, %v4182_v37 }
 0x353   : > { %1143 = vrot.lane.b32.xlu1 %v1104_v43, %s3465_s10  ;;  %3004 = vpow2.f32 %v1025_v45  ;;  %v999_v53 = vmul.f32 0.5, %v4191_v44  ;;  %2049 = vst.msk [vmem:[%s4023_s15 + $0x70] sm:$0xff] %vm1204_vm0, %v4191_v44  ;;  %v1754_v38 = vmul.f32 %v4089_v50, %v4089_v50  ;;  %v1756_v40 = vmul.f32 %v4111_v63, %v4111_v63 }
 0x354   : > { %2067 = vst.msk [vmem:[%s4023_s15 + $0x78] sm:$0xff] %vm2051_vm1, %v4182_v37  ;;  %v4206_v16 = vpop.eup %2994  ;;  %1141 = vrot.lane.b32.xlu0 %v1103_v46, %s3465_s10  ;;  %v1031_v55 = vmul.f32 1.442695, %v1000_v48  ;;  %2066 = vst.msk [vmem:[%s4023_s15 + $0x70] sm:$0xff] %vm2051_vm1, %v4191_v44  ;;  %v1757_v43 = vmul.f32 %v4143_v14, %v4143_v14  ;;  %v1758_v45 = vmul.f32 %v4134_v9, %v4134_v9 }
 0x355   : > { %v4212_v56 = vpop.eup %2996  ;;  %v1106_v57 = vmul.f32 %v4206_v16, %v1068_v24  ;;  %v1029_v59 = vmul.f32 1.442695, %v999_v53  ;;  %v1078_v13 = vpop.permute.xlu0 %1077  ;;  %v1748_v24 = vmul.f32 %v4015_v17, %v4015_v17  ;;  %v1759_v46 = vmul.f32 %v4166_v27, %v4166_v27 }
 0x356   : > { %v1105_v60 = vmul.f32 %v4212_v56, %v1066_v29  ;;  %3006 = vpow2.f32 %v1031_v55  ;;  %v1749_v29 = vmul.f32 %v4042_v28, %v4042_v28  ;;  %v1761_v48 = vmul.f32 %v4191_v44, %v4191_v44 }
 0x357   : > { %1147 = vrot.lane.b32.xlu1 %v1106_v57, %s3465_s10  ;;  %3008 = vpow2.f32 %v1029_v59 }
 0x358   : > { %v4217_v61 = vpop.eup %2998  ;;  %1145 = vrot.lane.b32.xlu0 %v1105_v60, %s3465_s10 }
 0x359   : > { %v4220_v1 = vpop.eup %3000  ;;  %v1108_v2 = vmul.f32 %v4217_v61, %v1072_v47  ;;  %v1760_v47 = vmul.f32 %v4159_v22, %v4159_v22 }
 0x35a   : > { %v1107_v4 = vmul.f32 %v4220_v1, %v1070_v51 }
 0x35b   : > { %1151 = vrot.lane.b32.xlu1 %v1108_v2, %s3465_s10 }
 0x35c   : > { %v4225_v5 = vpop.eup %3002  ;;  %1149 = vrot.lane.b32.xlu0 %v1107_v4, %s3465_s10 }
 0x35d   : > { %v4228_v6 = vpop.eup %3004  ;;  %v1110_v7 = vmul.f32 %v4225_v5, %v1076_v0 }
 0x35e   : > { %v1109_v10 = vmul.f32 %v4228_v6, %v1074_v3 }
 0x35f   : > { %1155 = vrot.lane.b32.xlu1 %v1110_v7, %s3465_s10 }
 0x360   : > { %v4233_v15 = vpop.eup %3006  ;;  %1153 = vrot.lane.b32.xlu0 %v1109_v10, %s3465_s10 }
 0x361   : > { %v4236_v58 = vpop.eup %3008  ;;  %v1112_v18 = vmul.f32 %v4233_v15, %v1080_v11 }
 0x362   : > { %v1111_v20 = vmul.f32 %v4236_v58, %v1078_v13 }
 0x363   : > { %1159 = vrot.lane.b32.xlu1 %v1112_v18, %s3465_s10 }
 0x364   : > { %1157 = vrot.lane.b32.xlu0 %v1111_v20, %s3465_s10 }
 0x367   : > { %1779 = vrot.lane.b32.xlu1 %v1747_v21, %s3464_s25 }
 0x368   : > { %1795 = vrot.lane.b32.xlu0 %v1755_v23, %s3464_s25 }
 0x36b   : > { %1781 = vrot.lane.b32.xlu1 %v1748_v24, %s3464_s25 }
 0x36c   : > { %1809 = vrot.lane.b32.xlu0 %v1762_v26, %s3464_s25 }
 0x36f   : > { %1783 = vrot.lane.b32.xlu1 %v1749_v29, %s3464_s25 }
 0x373   : > { %1785 = vrot.lane.b32.xlu1 %v1750_v30, %s3464_s25 }
 0x377   : > { %1787 = vrot.lane.b32.xlu1 %v1751_v31, %s3464_s25 }
 0x37b   : > { %1789 = vrot.lane.b32.xlu1 %v1752_v32, %s3464_s25 }
 0x37f   : > { %1791 = vrot.lane.b32.xlu1 %v1753_v33, %s3464_s25 }
 0x383   : > { %1793 = vrot.lane.b32.xlu1 %v1754_v38, %s3464_s25 }
 0x387   : > { %1797 = vrot.lane.b32.xlu1 %v1756_v40, %s3464_s25 }
 0x38b   : > { %1799 = vrot.lane.b32.xlu1 %v1757_v43, %s3464_s25 }
 0x38f   : > { %1801 = vrot.lane.b32.xlu1 %v1758_v45, %s3464_s25 }
 0x393   : > { %1803 = vrot.lane.b32.xlu1 %v1759_v46, %s3464_s25 }
 0x397   : > { %1805 = vrot.lane.b32.xlu1 %v1760_v47, %s3464_s25 }
 0x39b   : > { %1807 = vrot.lane.b32.xlu1 %v1761_v48, %s3464_s25 }
 0x3ad   : > { %v1132_v51 = vpop.permute.xlu1 %1131 }
 0x3ae   : > { %v1130_v53 = vpop.permute.xlu0 %1129  ;;  %v4292_v57 = vadd.f32 %v1132_v51, %v4015_v17 }
 0x3af   : > { %v1177_v55 = vadd.f32 %v1130_v53, %v4018_v19  ;;  %v1732_v53 = vadd.f32 1.0, %v4015_v17  ;;  %v1733_v17 = vadd.f32 1.0, %v4042_v28 }
 0x3b1   : > { %2068 = vrot.lane.b32.xlu1 %v1177_v55, %s3466_s2  ;;  %2685 = vmatprep.mubr.msk.f32.mxu1 %vm1204_vm0, %v1177_v55 }
 0x3b2   : > { %2686 = vmatmul.mubr.msk.f32.vlgmr.msra.gmra.mrb[32].mxu1 %vm1204_vm0, %v4292_v57 }
 0x3b5   : > { %v1136_v59 = vpop.permute.xlu1 %1135 }
 0x3b6   : > { %v1180_v60 = vadd.f32 %v1136_v59, %v4039_v25  ;;  %v1134_v0 = vpop.permute.xlu0 %1133  ;;  %v1731_v59 = vadd.f32 1.0, %v4018_v19  ;;  %v1846_v19 = vmul.f32 %v4086_v49, %v4086_v49  ;;  %v1419_v49 = vld [vmem:[#allocation16 + $0x28] sm:$0xff] }
 0x3b7   : > { %v1179_v2 = vadd.f32 %v1134_v0, %v4042_v28 }
 0x3b8   : > { %2074 = vrot.lane.b32.xlu1 %v1180_v60, %s3466_s2 }
 0x3b9   : > { %2688 = vmatprep.mubr.msk.f32.mxu1 %vm1204_vm0, %v1179_v2 }
 0x3ba   : > { %2689 = vmatmul.mubr.msk.f32.gmra.mrb[34].mxu1 %vm1204_vm0, %v1180_v60  ;;  %v1844_v60 = vmul.f32 %v4058_v35, %v4058_v35 }
 0x3bc   : > { %2072 = vrot.lane.b32.xlu1 %v1179_v2, %s3466_s2 }
 0x3bd   : > { %v1140_v3 = vpop.permute.xlu1 %1139 }
 0x3be   : > { %v1138_v4 = vpop.permute.xlu0 %1137  ;;  %v4308_v10 = vadd.f32 %v1140_v3, %v4061_v36 }
 0x3bf   : > { %v4305_v7 = vadd.f32 %v1138_v4, %v4067_v41 }
 0x3c1   : > { %2691 = vmatprep.mubr.msk.f32.mxu1 %vm1204_vm0, %v4305_v7 }
 0x3c2   : > { %2692 = vmatmul.mubr.msk.f32.gmra.mrb[36].mxu1 %vm1204_vm0, %v4308_v10 }
 0x3c5   : > { %v1144_v11 = vpop.permute.xlu1 %1143 }
 0x3c6   : > { %v1142_v13 = vpop.permute.xlu0 %1141  ;;  %v4318_v20 = vadd.f32 %v1144_v11, %v4089_v50  ;;  %v1843_v11 = vmul.f32 %v4063_v39, %v4063_v39 }
 0x3c7   : > { %v4315_v18 = vadd.f32 %v1142_v13, %v4095_v54 }
 0x3c9   : > { %v1148_v21 = vpop.permute.xlu1 %1147  ;;  %2694 = vmatprep.mubr.msk.f32.mxu1 %vm1204_vm0, %v4315_v18 }
 0x3ca   : > { %2695 = vmatmul.mubr.msk.f32.gmra.mrb[38].mxu1 %vm1204_vm0, %v4318_v20  ;;  %v1146_v23 = vpop.permute.xlu0 %1145  ;;  %v4328_v26 = vadd.f32 %v1148_v21, %v4111_v63  ;;  %v1734_v21 = vadd.f32 1.0, %v4039_v25  ;;  %v1414_v25 = vld [vmem:[#allocation16] sm:$0xff] }
 0x3cb   : > { %v4325_v24 = vadd.f32 %v1146_v23, %v4118_v62 }
 0x3cd   : > { %v1152_v29 = vpop.permute.xlu1 %1151  ;;  %2697 = vmatprep.mubr.msk.f32.mxu1 %vm1204_vm0, %v4325_v24 }
 0x3ce   : > { %2698 = vmatmul.mubr.msk.f32.gmra.mrb[40].mxu1 %vm1204_vm0, %v4328_v26  ;;  %v1150_v30 = vpop.permute.xlu0 %1149  ;;  %v4338_v32 = vadd.f32 %v1152_v29, %v4134_v9 }
 0x3cf   : > { %v4335_v31 = vadd.f32 %v1150_v30, %v4143_v14 }
 0x3d1   : > { %v1156_v33 = vpop.permute.xlu1 %1155  ;;  %2700 = vmatprep.mubr.msk.f32.mxu1 %vm1204_vm0, %v4335_v31 }
 0x3d2   : > { %2701 = vmatmul.mubr.msk.f32.gmra.mrb[42].mxu1 %vm1204_vm0, %v4338_v32  ;;  %v1154_v38 = vpop.permute.xlu0 %1153  ;;  %v4348_v43 = vadd.f32 %v1156_v33, %v4159_v22  ;;  %v1415_v33 = vld [vmem:[#allocation16 + $0x8] sm:$0xff] }
 0x3d3   : > { %v4345_v40 = vadd.f32 %v1154_v38, %v4166_v27  ;;  %v1417_v38 = vld [vmem:[#allocation16 + $0x18] sm:$0xff] }
 0x3d4   : > { %v2781_v39 = vpack.c.bf16 %v1417_v38, %v1415_v33 }
 0x3d5   : > { %v1160_v45 = vpop.permute.xlu1 %1159  ;;  %2703 = vmatprep.mubr.msk.f32.mxu1 %vm1204_vm0, %v4345_v40 }
 0x3d6   : > { %2704 = vmatmul.mubr.msk.f32.gmra.mrb[44].mxu1 %vm1204_vm0, %v4348_v43  ;;  %v1158_v46 = vpop.permute.xlu0 %1157  ;;  %v4358_v48 = vadd.f32 %v1160_v45, %v4182_v37  ;;  %2782 = vmatprep.subr.bf16.mxu0 %v2781_v39  ;;  %v1427_v39 = vld [vmem:[#allocation16 + $0x68] sm:$0xff] }
 0x3d7   : > { %v4355_v47 = vadd.f32 %v1158_v46, %v4191_v44  ;;  %v1845_v46 = vmul.f32 %v4091_v52, %v4091_v52 }
 0x3d9   : > { %v1780_v51 = vpop.permute.xlu1 %1779  ;;  %2706 = vmatprep.mubr.msk.f32.mxu1 %vm1204_vm0, %v4355_v47 }
 0x3da   : > { %2707 = vmatmul.mubr.msk.f32.gmra.mrb[46].mxu1 %vm1204_vm0, %v4358_v48  ;;  %v1827_v2 = vsub.f32 %v1731_v59, %v1780_v51  ;;  %v1416_v51 = vld [vmem:[#allocation16 + $0x10] sm:$0xff] }
 0x3db   : > { %v2783_v28 = vpack.c.bf16 %v1416_v51, %v1414_v25  ;;  %v1847_v25 = vmul.f32 %v4139_v12, %v4139_v12  ;;  %v1426_v51 = vld [vmem:[#allocation16 + $0x60] sm:$0xff]  ;;  %v1852_v12 = vmul.f32 %v4206_v16, %v4206_v16  ;;  %v1849_v16 = vmul.f32 %v4187_v42, %v4187_v42 }
 0x3dc   : > { %v1859_v13 = vsub.f32 %v1827_v2, %v1843_v11  ;;  %v1418_v2 = vld [vmem:[#allocation16 + $0x20] sm:$0xff]  ;;  %v1423_v11 = vld [vmem:[#allocation16 + $0x48] sm:$0xff]  ;;  %v1746_v42 = vadd.f32 1.0, %v4182_v37 }
 0x3dd   : > { %v1782_v55 = vpop.permute.xlu1 %1781  ;;  %2784 = vmatpush1.bf16.msra.mxu0 %v2783_v28  ;;  %v1443_v37 = vld [vmem:[#allocation16 + $0xe8] sm:$0xff] }
 0x3de   : > { %v1828_v0 = vsub.f32 %v1732_v53, %v1782_v55  ;;  %v1421_v55 = vld [vmem:[#allocation16 + $0x38] sm:$0xff] }
 0x3e0   : > { %v1860_v3 = vsub.f32 %v1828_v0, %v1844_v60  ;;  %v2785_v60 = vpack.c.bf16 %v1421_v55, %v1419_v49  ;;  %v1736_v0 = vadd.f32 1.0, %v4061_v36  ;;  %v1422_v36 = vld [vmem:[#allocation16 + $0x40] sm:$0xff]  ;;  %v1737_v55 = vadd.f32 1.0, %v4095_v54 }
 0x3e1   : > { %v1784_v4 = vpop.permute.xlu1 %1783 }
 0x3e2   : > { %1893 = vrot.lane.b32.xlu0 %v1860_v3, %s3465_s10  ;;  %v1829_v35 = vsub.f32 %v1733_v17, %v1784_v4  ;;  %v1420_v3 = vld [vmem:[#allocation16 + $0x30] sm:$0xff]  ;;  %2786 = vmatprep.subr.bf16.mxu0 %v2785_v60  ;;  %v1735_v17 = vadd.f32 1.0, %v4067_v41  ;;  %v1738_v41 = vadd.f32 1.0, %v4089_v50  ;;  %v1431_v60 = vld [vmem:[#allocation16 + $0x88] sm:$0xff]  ;;  %v1850_v50 = vmul.f32 %v4179_v34, %v4179_v34  ;;  %v1434_v34 = vld [vmem:[#allocation16 + $0xa0] sm:$0xff] }
 0x3e3   : > { %v2787_v52 = vpack.c.bf16 %v1420_v3, %v1418_v2 }
 0x3e4   : > { %v1861_v53 = vsub.f32 %v1829_v35, %v1845_v46  ;;  %v1429_v46 = vld [vmem:[#allocation16 + $0x78] sm:$0xff] }
 0x3e5   : > { %v1786_v23 = vpop.permute.xlu1 %1785  ;;  %2788 = vmatpush1.bf16.msra.mxu0 %v2787_v52  ;;  %v1430_v52 = vld [vmem:[#allocation16 + $0x80] sm:$0xff] }
 0x3e6   : > { %v1830_v29 = vsub.f32 %v1734_v21, %v1786_v23  ;;  %1891 = vrot.lane.b32.xlu0 %v1859_v13, %s3465_s10  ;;  %v1425_v13 = vld [vmem:[#allocation16 + $0x58] sm:$0xff] }
 0x3e7   : > { %v2789_v23 = vpack.c.bf16 %v1425_v13, %v1423_v11 }
 0x3e8   : > { %v1862_v30 = vsub.f32 %v1830_v29, %v1846_v19  ;;  %v1848_v19 = vmul.f32 %v4131_v8, %v4131_v8  ;;  %v1424_v29 = vld [vmem:[#allocation16 + $0x50] sm:$0xff]  ;;  %v2793_v8 = vpack.c.bf16 %v1429_v46, %v1427_v39 }
 0x3e9   : > { %v1788_v45 = vpop.permute.xlu1 %1787  ;;  %2790 = vmatprep.subr.bf16.mxu0 %v2789_v23  ;;  %v2791_v35 = vpack.c.bf16 %v1424_v29, %v1422_v36  ;;  %v1437_v36 = vld [vmem:[#allocation16 + $0xb8] sm:$0xff]  ;;  %v1739_v29 = vadd.f32 1.0, %v4118_v62  ;;  %v1851_v62 = vmul.f32 %v4212_v56, %v4212_v56  ;;  %v1742_v56 = vadd.f32 1.0, %v4134_v9 }
 0x3ea   : > { %1897 = vrot.lane.b32.xlu0 %v1862_v30, %s3465_s10  ;;  %v1831_v30 = vsub.f32 %v1735_v17, %v1788_v45  ;;  %v1740_v45 = vadd.f32 1.0, %v4111_v63  ;;  %v1796_v63 = vpop.permute.xlu0 %1795  ;;  %v1854_v9 = vmul.f32 %v4217_v61, %v4217_v61 }
 0x3eb   : > { %2792 = vmatpush1.bf16.msra.mxu0 %v2791_v35 }
 0x3ec   : > { %2794 = vmatprep.subr.bf16.mxu0 %v2793_v8 }
 0x3ed   : > { %v1790_v59 = vpop.permute.xlu1 %1789 }
 0x3ee   : > { %1895 = vrot.lane.b32.xlu0 %v1861_v53, %s3465_s10  ;;  %v1832_v4 = vsub.f32 %v1736_v0, %v1790_v59  ;;  %v1863_v53 = vsub.f32 %v1831_v30, %v1847_v25  ;;  %v1433_v0 = vld [vmem:[#allocation16 + $0x98] sm:$0xff]  ;;  %v1436_v30 = vld [vmem:[#allocation16 + $0xb0] sm:$0xff]  ;;  %v1810_v39 = vpop.permute.xlu0 %1809  ;;  %v1439_v25 = vld [vmem:[#allocation16 + $0xc8] sm:$0xff] }
 0x3ef   : > { %v2797_v3 = vpack.c.bf16 %v1433_v0, %v1431_v60  ;;  %v1442_v60 = vld [vmem:[#allocation16 + $0xe0] sm:$0xff]  ;;  %v1444_v0 = vld [vmem:[#allocation16 + $0xf0] sm:$0xff] }
 0x3f0   : > { %v1864_v33 = vsub.f32 %v1832_v4, %v1848_v19  ;;  %v1432_v4 = vld [vmem:[#allocation16 + $0x90] sm:$0xff]  ;;  %v1435_v19 = vld [vmem:[#allocation16 + $0xa8] sm:$0xff] }
 0x3f1   : > { %v1792_v21 = vpop.permute.xlu1 %1791  ;;  %v2799_v11 = vpack.c.bf16 %v1432_v4, %v1430_v52  ;;  %v2801_v35 = vpack.c.bf16 %v1437_v36, %v1435_v19 }
 0x3f2   : > { %2070 = vrot.lane.b32.xlu0 %v4292_v57, %s3466_s2  ;;  %v1428_v57 = vld [vmem:[#allocation16 + $0x70] sm:$0xff]  ;;  %v1833_v13 = vsub.f32 %v1737_v55, %v1792_v21  ;;  %v2803_v21 = vpack.c.bf16 %v1436_v30, %v1434_v34 }
 0x3f3   : > { %v2795_v28 = vpack.c.bf16 %v1428_v57, %v1426_v51  ;;  %v1438_v51 = vld [vmem:[#allocation16 + $0xc0] sm:$0xff]  ;;  %v1440_v57 = vld [vmem:[#allocation16 + $0xd0] sm:$0xff] }
 0x3f5   : > { %v1794_v38 = vpop.permute.xlu1 %1793  ;;  %2796 = vmatpush1.bf16.msra.mxu0 %v2795_v28  ;;  %v2807_v28 = vpack.c.bf16 %v1440_v57, %v1438_v51 }
 0x3f6   : > { %1901 = vrot.lane.b32.xlu0 %v1864_v33, %s3465_s10  ;;  %v1834_v49 = vsub.f32 %v1738_v41, %v1794_v38  ;;  %2798 = vmatprep.subr.bf16.mxu0 %v2797_v3  ;;  %v1835_v33 = vsub.f32 %v1739_v29, %v1796_v63  ;;  %v1865_v38 = vsub.f32 %v1833_v13, %v1849_v16  ;;  %v1441_v41 = vld [vmem:[#allocation16 + $0xd8] sm:$0xff]  ;;  %v1741_v3 = vadd.f32 1.0, %v4143_v14 }
 0x3f7   : > { %v2805_v8 = vpack.c.bf16 %v1441_v41, %v1439_v25  ;;  %v1853_v63 = vmul.f32 %v4220_v1, %v4220_v1  ;;  %v1744_v14 = vadd.f32 1.0, %v4159_v22  ;;  %v1856_v13 = vmul.f32 %v4225_v5, %v4225_v5 }
 0x3f8   : > { %v1866_v54 = vsub.f32 %v1834_v49, %v1850_v50  ;;  %v1842_v49 = vsub.f32 %v1746_v42, %v1810_v39  ;;  %v1745_v5 = vadd.f32 1.0, %v4191_v44 }
 0x3f9   : > { %v1798_v59 = vpop.permute.xlu1 %1797  ;;  %2800 = vmatpush1.bf16.msra.mxu0 %v2799_v11  ;;  %v1743_v11 = vadd.f32 1.0, %v4166_v27 }
 0x3fa   : > { %v1836_v2 = vsub.f32 %v1740_v45, %v1798_v59  ;;  %1899 = vrot.lane.b32.xlu0 %v1863_v53, %s3465_s10  ;;  %2802 = vmatprep.subr.bf16.mxu0 %v2801_v35  ;;  %v1867_v53 = vsub.f32 %v1835_v33, %v1851_v62  ;;  %v1858_v45 = vmul.f32 %v4233_v15, %v4233_v15  ;;  %v3467_v15 = vmov 0.0  }
 0x3fb   : > { %1522 = vmatprep.mubr.f32.mxu0 %v3467_v15 }
 0x3fc   : > { %v1868_v23 = vsub.f32 %v1836_v2, %v1852_v12  ;;  %v1874_v50 = vsub.f32 %v1842_v49, %v1858_v45  ;;  %v2811_v2 = vpack.c.bf16 %v1444_v0, %v1442_v60 }
 0x3fd   : > { %v1800_v17 = vpop.permute.xlu1 %1799  ;;  %2804 = vmatpush1.bf16.msra.mxu0 %v2803_v21 }
 0x3fe   : > { %1905 = vrot.lane.b32.xlu0 %v1866_v54, %s3465_s10  ;;  %1909 = vrot.lane.b32.xlu1 %v1868_v23, %s3465_s10  ;;  %v1855_v54 = vmul.f32 %v4228_v6, %v4228_v6  ;;  %v1857_v23 = vmul.f32 %v4236_v58, %v4236_v58 }
 0x3ff   : > { %2806 = vmatprep.subr.bf16.mxu0 %v2805_v8 }
 0x401   : > { %v1802_v46 = vpop.permute.xlu1 %1801  ;;  %2808 = vmatpush1.bf16.msra.mxu0 %v2807_v28 }
 0x402   : > { %1903 = vrot.lane.b32.xlu0 %v1865_v38, %s3465_s10  ;;  %2078 = vrot.lane.b32.xlu1 %v4308_v10, %s3466_s2  ;;  %v1445_v10 = vld [vmem:[#allocation16 + $0xf8] sm:$0xff]  ;;  %v1838_v12 = vsub.f32 %v1742_v56, %v1802_v46 }
 0x403   : > { %v2809_v59 = vpack.c.bf16 %v1445_v10, %v1443_v37  ;;  %v4478_v10 = vld [vmem:[#allocation14] ss:$0 sm:$0xff] }
 0x404   : > { %v1870_v52 = vsub.f32 %v1838_v12, %v1854_v9 }
 0x405   : > { %v1804_v55 = vpop.permute.xlu1 %1803  ;;  %2810 = vmatprep.subr.bf16.mxu0 %v2809_v59 }
 0x406   : > { %2082 = vrot.lane.b32.xlu1 %v4318_v20, %s3466_s2  ;;  %1907 = vrot.lane.b32.xlu0 %v1867_v53, %s3465_s10  ;;  %v1837_v20 = vsub.f32 %v1741_v3, %v1800_v17  ;;  %v1839_v1 = vsub.f32 %v1743_v11, %v1804_v55 }
 0x407   : > { %2812 = vmatpush1.bf16.msra.mxu0 %v2811_v2 }
 0x408   : > { %v1869_v61 = vsub.f32 %v1837_v20, %v1853_v63  ;;  %v1871_v27 = vsub.f32 %v1839_v1, %v1855_v54 }
 0x409   : > { %v1806_v4 = vpop.permute.xlu1 %1805 }
 0x40a   : > { %2076 = vrot.lane.b32.xlu0 %v4305_v7, %s3466_s2  ;;  %1921 = vrot.lane.b32.xlu1 %v1874_v50, %s3465_s10  ;;  %v1840_v7 = vsub.f32 %v1744_v14, %v1806_v4 }
 0x40c   : > { %v1872_v22 = vsub.f32 %v1840_v7, %v1856_v13 }
 0x40e   : > { %1913 = vrot.lane.b32.xlu0 %v1870_v52, %s3465_s10  ;;  %2086 = vrot.lane.b32.xlu1 %v4328_v26, %s3466_s2  ;;  %v1808_v26 = vpop.permute.xlu1 %1807 }
 0x412   : > { %1911 = vrot.lane.b32.xlu0 %v1869_v61, %s3465_s10  ;;  %2090 = vrot.lane.b32.xlu1 %v4338_v32, %s3466_s2  ;;  %v1841_v32 = vsub.f32 %v1745_v5, %v1808_v26 }
 0x414   : > { %v1873_v6 = vsub.f32 %v1841_v32, %v1857_v23 }
 0x416   : > { %1917 = vrot.lane.b32.xlu0 %v1872_v22, %s3465_s10  ;;  %2094 = vrot.lane.b32.xlu1 %v4348_v43, %s3466_s2 }
 0x41a   : > { %1915 = vrot.lane.b32.xlu0 %v1871_v27, %s3465_s10 }
 0x41e   : > { %2080 = vrot.lane.b32.xlu0 %v4315_v18, %s3466_s2 }
 0x422   : > { %1919 = vrot.lane.b32.xlu0 %v1873_v6, %s3465_s10 }
 0x423   : > { %v2069_v43 = vpop.permute.xlu1 %2068 }
 0x424   : > { %2117 = vst.msk [vmem:[%s4023_s15] sm:$0xff] %vm2116_vm2, %v2069_v43 }
 0x426   : > { %2084 = vrot.lane.b32.xlu0 %v4325_v24, %s3466_s2 }
 0x42a   : > { %v2075_v44 = vpop.permute.xlu1 %2074  ;;  %2088 = vrot.lane.b32.xlu0 %v4335_v31, %s3466_s2 }
 0x42b   : > { %2120 = vst.msk [vmem:[%s4023_s15 + $0x18] sm:$0xff] %vm2116_vm2, %v2075_v44 }
 0x42e   : > { %v2073_v58 = vpop.permute.xlu1 %2072  ;;  %2092 = vrot.lane.b32.xlu0 %v4345_v40, %s3466_s2 }
 0x42f   : > { %2119 = vst.msk [vmem:[%s4023_s15 + $0x10] sm:$0xff] %vm2116_vm2, %v2073_v58 }
 0x454   : > { %v1894_v18 = vpop.permute.xlu0 %1893 }
 0x455   : > { %v1942_v17 = vsel %vm1204_vm0, %v1894_v18, 0.0 }
 0x456   : > { %1943 = vadd.xlane.f32.xlu0 %v1942_v17 }
 0x458   : > { %v1892_v19 = vpop.permute.xlu0 %1891 }
 0x459   : > { %v1939_v24 = vsel %vm1204_vm0, %v1892_v19, 0.0 }
 0x45a   : > { %1940 = vadd.xlane.f32.xlu1 %v1939_v24 }
 0x45c   : > { %v1898_v36 = vpop.permute.xlu0 %1897 }
 0x45d   : > { %v1948_v31 = vsel %vm1204_vm0, %v1898_v36, 0.0 }
 0x45e   : > { %1949 = vadd.xlane.f32.xlu1 %v1948_v31 }
 0x460   : > { %v1896_v34 = vpop.permute.xlu0 %1895 }
 0x461   : > { %v1945_v29 = vsel %vm1204_vm0, %v1896_v34, 0.0 }
 0x462   : > { %1946 = vadd.xlane.f32.xlu0 %v1945_v29 }
 0x464   : > { %v2071_v40 = vpop.permute.xlu0 %2070 }
 0x465   : > { %2118 = vst.msk [vmem:[%s4023_s15 + $0x8] sm:$0xff] %vm2116_vm2, %v2071_v40 }
 0x468   : > { %v1902_v16 = vpop.permute.xlu0 %1901 }
 0x469   : > { %v1954_v35 = vsel %vm1204_vm0, %v1902_v16, 0.0 }
 0x46a   : > { %1955 = vadd.xlane.f32.xlu1 %v1954_v35 }
 0x46c   : > { %v1900_v30 = vpop.permute.xlu0 %1899 }
 0x46d   : > { %v1951_v21 = vsel %vm1204_vm0, %v1900_v30, 0.0 }
 0x46e   : > { %1952 = vadd.xlane.f32.xlu0 %v1951_v21 }
 0x470   : > { %v1910_v33 = vpop.permute.xlu1 %1909  ;;  %v1906_v38 = vpop.permute.xlu0 %1905 }
 0x471   : > { %v1960_v39 = vsel %vm1204_vm0, %v1906_v38, 0.0  ;;  %v1966_v41 = vsel %vm1204_vm0, %v1910_v33, 0.0 }
 0x472   : > { %1961 = vadd.xlane.f32.xlu1 %v1960_v39 }
 0x474   : > { %v2079_v46 = vpop.permute.xlu1 %2078  ;;  %v1904_v25 = vpop.permute.xlu0 %1903 }
 0x475   : > { %2122 = vst.msk [vmem:[%s4023_s15 + $0x28] sm:$0xff] %vm2116_vm2, %v2079_v46  ;;  %v1957_v62 = vsel %vm1204_vm0, %v1904_v25, 0.0 }
 0x476   : > { %1967 = vadd.xlane.f32.xlu1 %v1966_v41  ;;  %1958 = vadd.xlane.f32.xlu0 %v1957_v62 }
 0x478   : > { %v2083_v42 = vpop.permute.xlu1 %2082  ;;  %v1908_v8 = vpop.permute.xlu0 %1907 }
 0x479   : > { %2124 = vst.msk [vmem:[%s4023_s15 + $0x38] sm:$0xff] %vm2116_vm2, %v2083_v42  ;;  %v1963_v51 = vsel %vm1204_vm0, %v1908_v8, 0.0 }
 0x47a   : > { %1964 = vadd.xlane.f32.xlu0 %v1963_v51 }
 0x47c   : > { %v1922_v57 = vpop.permute.xlu1 %1921  ;;  %v2077_v28 = vpop.permute.xlu0 %2076 }
 0x47d   : > { %2121 = vst.msk [vmem:[%s4023_s15 + $0x20] sm:$0xff] %vm2116_vm2, %v2077_v28  ;;  %v1984_v63 = vsel %vm1204_vm0, %v1922_v57, 0.0 }
 0x480   : > { %v2087_v53 = vpop.permute.xlu1 %2086  ;;  %v1914_v49 = vpop.permute.xlu0 %1913 }
 0x481   : > { %2126 = vst.msk [vmem:[%s4023_s15 + $0x48] sm:$0xff] %vm2116_vm2, %v2087_v53  ;;  %v1972_v45 = vsel %vm1204_vm0, %v1914_v49, 0.0 }
 0x482   : > { %1973 = vadd.xlane.f32.xlu1 %v1972_v45 }
 0x484   : > { %v2091_v56 = vpop.permute.xlu1 %2090  ;;  %v1912_v37 = vpop.permute.xlu0 %1911 }
 0x485   : > { %2128 = vst.msk [vmem:[%s4023_s15 + $0x58] sm:$0xff] %vm2116_vm2, %v2091_v56  ;;  %v2687_v55 = vpop.f32.mrb[32].mxu1  ;;  %v1969_v59 = vsel %vm1204_vm0, %v1912_v37, 0.0 }
 0x486   : > { %v1319_v60 = vpop.f32.mrb[33].mxu1  ;;  %1970 = vadd.xlane.f32.xlu0 %v1969_v59  ;;  %v1325_v2 = vadd.f32 %v2687_v55, %v4478_v10  ;;  %v1448_v59 = vlaneseq }
 0x487   : > { %v1320_v0 = vadd.f32 %v4478_v10, %v1319_v60 }
 0x488   : > { %v2095_v50 = vpop.permute.xlu1 %2094  ;;  %v1918_v12 = vpop.permute.xlu0 %1917  ;;  %v1399_v52 = vmax.f32 %v1325_v2, 0.0  ;;  %v1449_v60 = vshrl.u32 %v1448_v59, 7 }
 0x489   : > { %v1398_v3 = vmax.f32 %v1320_v0, 0.0  ;;  %2130 = vst.msk [vmem:[%s4023_s15 + $0x68] sm:$0xff] %vm2116_vm2, %v2095_v50  ;;  %v1978_v9 = vsel %vm1204_vm0, %v1918_v12, 0.0  ;;  %v1446_v50 = vld [vmem:[#allocation17] sm:$0x3] }
 0x48a   : > { %1979 = vadd.xlane.f32.xlu1 %v1978_v9  ;;  %v1450_v0 = vsub.s32 0, %v1449_v60  ;;  %v1454_v12 = vsub.s32 1, %v1449_v60 }
 0x48b   : > { %1523 = vmatmul.mubr.f32.vlgmr.msra.gmra.mrb[16].mxu0 %v1398_v3 }
 0x48c   : > { %v1916_v20 = vpop.permute.xlu0 %1915  ;;  %1528 = vmatprep.mubr.f32.mxu0 %v3467_v15  ;;  %v4528_v2 = vrot.slane %v1446_v50, %v1450_v0  ;;  %v4530_v3 = vrot.slane %v1446_v50, %v1454_v12  ;;  %v3020_v12 = vld [vmem:[%s3894_s30 + $0x50] sm:$0xff] }
 0x48d   : > { %v2690_v4 = vpop.f32.mrb[34].mxu1  ;;  %v1975_v14 = vsel %vm1204_vm0, %v1916_v20, 0.0 }
 0x48e   : > { %v1329_v61 = vpop.f32.mrb[35].mxu1  ;;  %1985 = vadd.xlane.f32.xlu1 %v1984_v63  ;;  %1976 = vadd.xlane.f32.xlu0 %v1975_v14  ;;  %v1335_v13 = vadd.f32 %v2690_v4, %v4478_v10  ;;  %v3010_v4 = vld [vmem:[%s3894_s30] sm:$0xff]  ;;  %v3011_v14 = vld [vmem:[%s3894_s30 + $0x8] sm:$0xff] }
 0x48f   : > { %v1330_v7 = vadd.f32 %v4478_v10, %v1329_v61  ;;  %1529 = vmatmul.mubr.f32.gmra.mrb[18].mxu0 %v1399_v52 }
 0x490   : > { %v2081_v11 = vpop.permute.xlu0 %2080  ;;  %1534 = vmatprep.mubr.f32.mxu0 %v3467_v15  ;;  %v1401_v54 = vmax.f32 %v1335_v13, 0.0 }
 0x491   : > { %v1400_v1 = vmax.f32 %v1330_v7, 0.0  ;;  %2123 = vst.msk [vmem:[%s4023_s15 + $0x30] sm:$0xff] %vm2116_vm2, %v2081_v11 }
 0x493   : > { %1535 = vmatmul.mubr.f32.gmra.mrb[20].mxu0 %v1400_v1 }
 0x494   : > { %v1920_v22 = vpop.permute.xlu0 %1919  ;;  %1540 = vmatprep.mubr.f32.mxu0 %v3467_v15 }
 0x495   : > { %v2693_v27 = vpop.f32.mrb[36].mxu1  ;;  %v1981_v26 = vsel %vm1204_vm0, %v1920_v22, 0.0 }
 0x496   : > { %v1339_v5 = vpop.f32.mrb[37].mxu1  ;;  %1982 = vadd.xlane.f32.xlu0 %v1981_v26  ;;  %v1345_v6 = vadd.f32 %v2693_v27, %v4478_v10  ;;  %v3012_v27 = vld [vmem:[%s3894_s30 + $0x10] sm:$0xff] }
 0x497   : > { %v1340_v32 = vadd.f32 %v4478_v10, %v1339_v5  ;;  %1541 = vmatmul.mubr.f32.gmra.mrb[22].mxu0 %v1401_v54  ;;  %v3013_v5 = vld [vmem:[%s3894_s30 + $0x18] sm:$0xff] }
 0x498   : > { %v2085_v23 = vpop.permute.xlu0 %2084  ;;  %1546 = vmatprep.mubr.f32.mxu0 %v3467_v15  ;;  %v1403_v58 = vmax.f32 %v1345_v6, 0.0 }
 0x499   : > { %v1402_v43 = vmax.f32 %v1340_v32, 0.0  ;;  %2125 = vst.msk [vmem:[%s4023_s15 + $0x40] sm:$0xff] %vm2116_vm2, %v2085_v23 }
 0x49b   : > { %1547 = vmatmul.mubr.f32.gmra.mrb[24].mxu0 %v1402_v43 }
 0x49c   : > { %v2089_v44 = vpop.permute.xlu0 %2088  ;;  %1552 = vmatprep.mubr.f32.mxu0 %v3467_v15 }
 0x49d   : > { %2127 = vst.msk [vmem:[%s4023_s15 + $0x50] sm:$0xff] %vm2116_vm2, %v2089_v44  ;;  %v2696_v18 = vpop.f32.mrb[38].mxu1 }
 0x49e   : > { %v1349_v17 = vpop.f32.mrb[39].mxu1  ;;  %v1355_v36 = vadd.f32 %v2696_v18, %v4478_v10 }
 0x49f   : > { %v1350_v19 = vadd.f32 %v4478_v10, %v1349_v17  ;;  %1553 = vmatmul.mubr.f32.gmra.mrb[26].mxu0 %v1403_v58 }
 0x4a0   : > { %v2093_v24 = vpop.permute.xlu0 %2092  ;;  %1558 = vmatprep.mubr.f32.mxu0 %v3467_v15  ;;  %v1405_v40 = vmax.f32 %v1355_v36, 0.0  ;;  %v3015_v36 = vld [vmem:[%s3894_s30 + $0x28] sm:$0xff] }
 0x4a1   : > { %v1404_v31 = vmax.f32 %v1350_v19, 0.0  ;;  %2129 = vst.msk [vmem:[%s4023_s15 + $0x60] sm:$0xff] %vm2116_vm2, %v2093_v24  ;;  %v2699_v34 = vpop.f32.mrb[40].mxu1  ;;  %v3014_v19 = vld [vmem:[%s3894_s30 + $0x20] sm:$0xff] }
 0x4a2   : > { %v1359_v29 = vpop.f32.mrb[41].mxu1  ;;  %v1365_v21 = vadd.f32 %v2699_v34, %v4478_v10 }
 0x4a3   : > { %1559 = vmatmul.mubr.f32.gmra.mrb[28].mxu0 %v1404_v31  ;;  %v1360_v16 = vadd.f32 %v4478_v10, %v1359_v29 }
 0x4a4   : > { %1564 = vmatprep.mubr.f32.mxu0 %v3467_v15  ;;  %v1407_v46 = vmax.f32 %v1365_v21, 0.0 }
 0x4a5   : > { %v2702_v35 = vpop.f32.mrb[42].mxu1  ;;  %v1406_v33 = vmax.f32 %v1360_v16, 0.0 }
 0x4a6   : > { %v1369_v30 = vpop.f32.mrb[43].mxu1  ;;  %v1375_v42 = vadd.f32 %v2702_v35, %v4478_v10 }
 0x4a7   : > { %1565 = vmatmul.mubr.f32.gmra.mrb[30].mxu0 %v1405_v40  ;;  %v1370_v25 = vadd.f32 %v4478_v10, %v1369_v30 }
 0x4a8   : > { %1570 = vmatprep.mubr.f32.mxu0 %v3467_v15  ;;  %v1409_v51 = vmax.f32 %v1375_v42, 0.0 }
 0x4a9   : > { %v2705_v38 = vpop.f32.mrb[44].mxu1  ;;  %v1408_v8 = vmax.f32 %v1370_v25, 0.0 }
 0x4aa   : > { %v1379_v39 = vpop.f32.mrb[45].mxu1  ;;  %v1385_v28 = vadd.f32 %v2705_v38, %v4478_v10 }
 0x4ab   : > { %1571 = vmatmul.mubr.f32.gmra.mrb[32].mxu0 %v1406_v33  ;;  %v1380_v57 = vadd.f32 %v4478_v10, %v1379_v39  ;;  %v3016_v33 = vld [vmem:[%s3894_s30 + $0x30] sm:$0xff]  ;;  %v3017_v39 = vld [vmem:[%s3894_s30 + $0x38] sm:$0xff] }
 0x4ac   : > { %1576 = vmatprep.mubr.f32.mxu0 %v3467_v15  ;;  %v1411_v49 = vmax.f32 %v1385_v28, 0.0  ;;  %v3018_v28 = vld [vmem:[%s3894_s30 + $0x40] sm:$0xff] }
 0x4ad   : > { %v2708_v41 = vpop.f32.mrb[46].mxu1  ;;  %v1410_v53 = vmax.f32 %v1380_v57, 0.0 }
 0x4ae   : > { %v1389_v62 = vpop.f32.mrb[47].mxu1  ;;  %v1395_v56 = vadd.f32 %v2708_v41, %v4478_v10 }
 0x4af   : > { %1577 = vmatmul.mubr.f32.gmra.mrb[34].mxu0 %v1407_v46  ;;  %v1390_v45 = vadd.f32 %v4478_v10, %v1389_v62 }
 0x4b0   : > { %1582 = vmatprep.mubr.f32.mxu0 %v3467_v15  ;;  %v1413_v55 = vmax.f32 %v1395_v56, 0.0 }
 0x4b1   : > { %v1412_v37 = vmax.f32 %v1390_v45, 0.0 }
 0x4b3   : > { %1583 = vmatmul.mubr.f32.gmra.mrb[36].mxu0 %v1408_v8 }
 0x4b4   : > { %1588 = vmatprep.mubr.f32.mxu0 %v3467_v15 }
 0x4b7   : > { %1589 = vmatmul.mubr.f32.gmra.mrb[38].mxu0 %v1409_v51 }
 0x4b8   : > { %1594 = vmatprep.mubr.f32.mxu0 %v3467_v15 }
 0x4bb   : > { %1595 = vmatmul.mubr.f32.gmra.mrb[40].mxu0 %v1410_v53 }
 0x4bc   : > { %1600 = vmatprep.mubr.f32.mxu0 %v3467_v15 }
 0x4bf   : > { %1601 = vmatmul.mubr.f32.gmra.mrb[42].mxu0 %v1411_v49  ;;  %v3019_v49 = vld [vmem:[%s3894_s30 + $0x48] sm:$0xff] }
 0x4c0   : > { %1606 = vmatprep.mubr.f32.mxu0 %v3467_v15 }
 0x4c3   : > { %1607 = vmatmul.mubr.f32.gmra.mrb[44].mxu0 %v1412_v37 }
 0x4c4   : > { %1612 = vmatprep.mubr.f32.mxu0 %v3467_v15 }
 0x4c7   : > { %1613 = vmatmul.mubr.f32.gmra.mrb[46].mxu0 %v1413_v55 }
 0x55e   : > { %v1524_v9 = vpop.f32.mrb[16].mxu0 }
 0x55f   : > { %v1525_v10 = vadd.f32 %v1524_v9, %v4528_v2  ;;  %v1526_v20 = vpop.f32.mrb[17].mxu0 }
 0x560   : > { %v1527_v52 = vadd.f32 %v1526_v20, %v4530_v3 }
 0x561   : > { %v1619_v63 = vsub.f32 %v3010_v4, %v1525_v10  ;;  %2003 = vst [vmem:[%s4537_s28] sm:$0xff] %v1525_v10  ;;  %v3021_v10 = vld [vmem:[%s3894_s30 + $0x58] sm:$0xff] }
 0x562   : > { %v1620_v61 = vsub.f32 %v3011_v14, %v1527_v52  ;;  %2004 = vst [vmem:[%s4537_s28 + $0x8] sm:$0xff] %v1527_v52  ;;  %v1530_v7 = vpop.f32.mrb[18].mxu0 }
 0x563   : > { %v1651_v11 = vmul.f32 %v1619_v63, %v1619_v63  ;;  %v1531_v13 = vadd.f32 %v1530_v7, %v4528_v2  ;;  %v1532_v1 = vpop.f32.mrb[19].mxu0 }
 0x564   : > { %v1652_v22 = vmul.f32 %v1620_v61, %v1620_v61  ;;  %v1533_v54 = vadd.f32 %v1532_v1, %v4530_v3 }
 0x565   : > { %v1621_v26 = vsub.f32 %v3012_v27, %v1531_v13  ;;  %2005 = vst [vmem:[%s4537_s28 + $0x10] sm:$0xff] %v1531_v13  ;;  %v3022_v13 = vld [vmem:[%s3894_s30 + $0x60] sm:$0xff] }
 0x566   : > { %v1622_v32 = vsub.f32 %v3013_v5, %v1533_v54  ;;  %2006 = vst [vmem:[%s4537_s28 + $0x18] sm:$0xff] %v1533_v54  ;;  %v1536_v23 = vpop.f32.mrb[20].mxu0  ;;  %v1683_v6 = vadd.f32 %v1652_v22, %v1651_v11  ;;  %v3023_v22 = vld [vmem:[%s3894_s30 + $0x68] sm:$0xff] }
 0x567   : > { %v1653_v43 = vmul.f32 %v1621_v26, %v1621_v26  ;;  %v1537_v44 = vadd.f32 %v1536_v23, %v4528_v2  ;;  %v1538_v58 = vpop.f32.mrb[21].mxu0 }
 0x568   : > { %v1654_v18 = vmul.f32 %v1622_v32, %v1622_v32  ;;  %v1539_v17 = vadd.f32 %v1538_v58, %v4530_v3  ;;  %1684 = vadd.xlane.f32.xlu0 %v1683_v6 }
 0x569   : > { %v1623_v24 = vsub.f32 %v3014_v19, %v1537_v44  ;;  %2007 = vst [vmem:[%s4537_s28 + $0x20] sm:$0xff] %v1537_v44  ;;  %v3024_v44 = vld [vmem:[%s3894_s30 + $0x70] sm:$0xff] }
 0x56a   : > { %v1624_v31 = vsub.f32 %v3015_v36, %v1539_v17  ;;  %2008 = vst [vmem:[%s4537_s28 + $0x28] sm:$0xff] %v1539_v17  ;;  %v1542_v34 = vpop.f32.mrb[22].mxu0  ;;  %v1686_v29 = vadd.f32 %v1654_v18, %v1653_v43  ;;  %v3025_v18 = vld [vmem:[%s3894_s30 + $0x78] sm:$0xff] }
 0x56b   : > { %v1655_v40 = vmul.f32 %v1623_v24, %v1623_v24  ;;  %v1543_v16 = vadd.f32 %v1542_v34, %v4528_v2  ;;  %v1544_v35 = vpop.f32.mrb[23].mxu0 }
 0x56c   : > { %v1656_v30 = vmul.f32 %v1624_v31, %v1624_v31  ;;  %v1545_v21 = vadd.f32 %v1544_v35, %v4530_v3  ;;  %1687 = vadd.xlane.f32.xlu1 %v1686_v29 }
 0x56d   : > { %v1625_v38 = vsub.f32 %v3016_v33, %v1543_v16  ;;  %2009 = vst [vmem:[%s4537_s28 + $0x30] sm:$0xff] %v1543_v16  ;;  %v3026_v16 = vld [vmem:[%s3894_s30 + $0x80] sm:$0xff] }
 0x56e   : > { %v1626_v46 = vsub.f32 %v3017_v39, %v1545_v21  ;;  %2010 = vst [vmem:[%s4537_s28 + $0x38] sm:$0xff] %v1545_v21  ;;  %v1548_v25 = vpop.f32.mrb[24].mxu0  ;;  %v1689_v41 = vadd.f32 %v1656_v30, %v1655_v40  ;;  %v3027_v30 = vld [vmem:[%s3894_s30 + $0x88] sm:$0xff] }
 0x56f   : > { %v1657_v62 = vmul.f32 %v1625_v38, %v1625_v38  ;;  %v1549_v42 = vadd.f32 %v1548_v25, %v4528_v2  ;;  %v1550_v8 = vpop.f32.mrb[25].mxu0 }
 0x570   : > { %v1658_v51 = vmul.f32 %v1626_v46, %v1626_v46  ;;  %v1551_v57 = vadd.f32 %v1550_v8, %v4530_v3  ;;  %1690 = vadd.xlane.f32.xlu0 %v1689_v41 }
 0x571   : > { %v1627_v53 = vsub.f32 %v3018_v28, %v1549_v42  ;;  %2011 = vst [vmem:[%s4537_s28 + $0x40] sm:$0xff] %v1549_v42  ;;  %v3028_v42 = vld [vmem:[%s3894_s30 + $0x90] sm:$0xff] }
 0x572   : > { %v1628_v45 = vsub.f32 %v3019_v49, %v1551_v57  ;;  %2012 = vst [vmem:[%s4537_s28 + $0x48] sm:$0xff] %v1551_v57  ;;  %v1554_v56 = vpop.f32.mrb[26].mxu0  ;;  %v1692_v37 = vadd.f32 %v1658_v51, %v1657_v62  ;;  %v3029_v51 = vld [vmem:[%s3894_s30 + $0x98] sm:$0xff] }
 0x573   : > { %v1659_v55 = vmul.f32 %v1627_v53, %v1627_v53  ;;  %v1555_v59 = vadd.f32 %v1554_v56, %v4528_v2  ;;  %v1556_v60 = vpop.f32.mrb[27].mxu0 }
 0x574   : > { %v1660_v0 = vmul.f32 %v1628_v45, %v1628_v45  ;;  %v1557_v50 = vadd.f32 %v1556_v60, %v4530_v3  ;;  %1693 = vadd.xlane.f32.xlu0 %v1692_v37 }
 0x575   : > { %v1629_v9 = vsub.f32 %v3020_v12, %v1555_v59  ;;  %2013 = vst [vmem:[%s4537_s28 + $0x50] sm:$0xff] %v1555_v59  ;;  %v3030_v59 = vld [vmem:[%s3894_s30 + $0xa0] sm:$0xff] }
 0x576   : > { %v1630_v20 = vsub.f32 %v3021_v10, %v1557_v50  ;;  %2014 = vst [vmem:[%s4537_s28 + $0x58] sm:$0xff] %v1557_v50  ;;  %v1560_v52 = vpop.f32.mrb[28].mxu0  ;;  %v1695_v4 = vadd.f32 %v1660_v0, %v1659_v55  ;;  %v3031_v0 = vld [vmem:[%s3894_s30 + $0xa8] sm:$0xff] }
 0x577   : > { %v1661_v63 = vmul.f32 %v1629_v9, %v1629_v9  ;;  %v1561_v14 = vadd.f32 %v1560_v52, %v4528_v2  ;;  %v1562_v61 = vpop.f32.mrb[29].mxu0 }
 0x578   : > { %v1662_v7 = vmul.f32 %v1630_v20, %v1630_v20  ;;  %v1563_v11 = vadd.f32 %v1562_v61, %v4530_v3  ;;  %1696 = vadd.xlane.f32.xlu1 %v1695_v4 }
 0x579   : > { %v1631_v1 = vsub.f32 %v3022_v13, %v1561_v14  ;;  %2015 = vst [vmem:[%s4537_s28 + $0x60] sm:$0xff] %v1561_v14  ;;  %v3032_v14 = vld [vmem:[%s3894_s30 + $0xb0] sm:$0xff] }
 0x57a   : > { %v1632_v54 = vsub.f32 %v3023_v22, %v1563_v11  ;;  %2016 = vst [vmem:[%s4537_s28 + $0x68] sm:$0xff] %v1563_v11  ;;  %v1566_v27 = vpop.f32.mrb[30].mxu0  ;;  %v1698_v26 = vadd.f32 %v1662_v7, %v1661_v63  ;;  %v3033_v7 = vld [vmem:[%s3894_s30 + $0xb8] sm:$0xff] }
 0x57b   : > { %v1663_v5 = vmul.f32 %v1631_v1, %v1631_v1  ;;  %v1567_v32 = vadd.f32 %v1566_v27, %v4528_v2  ;;  %v1568_v23 = vpop.f32.mrb[31].mxu0 }
 0x57c   : > { %v1664_v6 = vmul.f32 %v1632_v54, %v1632_v54  ;;  %v1569_v43 = vadd.f32 %v1568_v23, %v4530_v3  ;;  %1699 = vadd.xlane.f32.xlu0 %v1698_v26 }
 0x57d   : > { %v1633_v58 = vsub.f32 %v3024_v44, %v1567_v32  ;;  %2017 = vst [vmem:[%s4537_s28 + $0x70] sm:$0xff] %v1567_v32  ;;  %v3034_v32 = vld [vmem:[%s3894_s30 + $0xc0] sm:$0xff] }
 0x57e   : > { %v1634_v17 = vsub.f32 %v3025_v18, %v1569_v43  ;;  %2018 = vst [vmem:[%s4537_s28 + $0x78] sm:$0xff] %v1569_v43  ;;  %v1572_v19 = vpop.f32.mrb[32].mxu0  ;;  %v1701_v24 = vadd.f32 %v1664_v6, %v1663_v5  ;;  %v3035_v6 = vld [vmem:[%s3894_s30 + $0xc8] sm:$0xff] }
 0x57f   : > { %v1665_v36 = vmul.f32 %v1633_v58, %v1633_v58  ;;  %v1573_v31 = vadd.f32 %v1572_v19, %v4528_v2  ;;  %v1574_v34 = vpop.f32.mrb[33].mxu0 }
 0x580   : > { %v1666_v29 = vmul.f32 %v1634_v17, %v1634_v17  ;;  %v1575_v40 = vadd.f32 %v1574_v34, %v4530_v3  ;;  %1702 = vadd.xlane.f32.xlu1 %v1701_v24 }
 0x581   : > { %v1635_v35 = vsub.f32 %v3026_v16, %v1573_v31  ;;  %2019 = vst [vmem:[%s4537_s28 + $0x80] sm:$0xff] %v1573_v31  ;;  %v3036_v31 = vld [vmem:[%s3894_s30 + $0xd0] sm:$0xff] }
 0x582   : > { %v1636_v21 = vsub.f32 %v3027_v30, %v1575_v40  ;;  %2020 = vst [vmem:[%s4537_s28 + $0x88] sm:$0xff] %v1575_v40  ;;  %v1578_v33 = vpop.f32.mrb[34].mxu0  ;;  %v1704_v38 = vadd.f32 %v1666_v29, %v1665_v36  ;;  %v3037_v29 = vld [vmem:[%s3894_s30 + $0xd8] sm:$0xff] }
 0x583   : > { %v1667_v39 = vmul.f32 %v1635_v35, %v1635_v35  ;;  %v1579_v46 = vadd.f32 %v1578_v33, %v4528_v2  ;;  %v1580_v25 = vpop.f32.mrb[35].mxu0 }
 0x584   : > { %v1668_v41 = vmul.f32 %v1636_v21, %v1636_v21  ;;  %v1581_v62 = vadd.f32 %v1580_v25, %v4530_v3  ;;  %1705 = vadd.xlane.f32.xlu0 %v1704_v38 }
 0x585   : > { %v1637_v8 = vsub.f32 %v3028_v42, %v1579_v46  ;;  %2021 = vst [vmem:[%s4537_s28 + $0x90] sm:$0xff] %v1579_v46  ;;  %v3038_v46 = vld [vmem:[%s3894_s30 + $0xe0] sm:$0xff] }
 0x586   : > { %v1638_v57 = vsub.f32 %v3029_v51, %v1581_v62  ;;  %2022 = vst [vmem:[%s4537_s28 + $0x98] sm:$0xff] %v1581_v62  ;;  %v1584_v28 = vpop.f32.mrb[36].mxu0  ;;  %v1707_v53 = vadd.f32 %v1668_v41, %v1667_v39  ;;  %v3039_v41 = vld [vmem:[%s3894_s30 + $0xe8] sm:$0xff] }
 0x587   : > { %v1669_v49 = vmul.f32 %v1637_v8, %v1637_v8  ;;  %v1585_v45 = vadd.f32 %v1584_v28, %v4528_v2  ;;  %v1586_v56 = vpop.f32.mrb[37].mxu0 }
 0x588   : > { %v1670_v37 = vmul.f32 %v1638_v57, %v1638_v57  ;;  %v1587_v55 = vadd.f32 %v1586_v56, %v4530_v3  ;;  %1708 = vadd.xlane.f32.xlu1 %v1707_v53 }
 0x589   : > { %v1639_v60 = vsub.f32 %v3030_v59, %v1585_v45  ;;  %2023 = vst [vmem:[%s4537_s28 + $0xa0] sm:$0xff] %v1585_v45  ;;  %v3040_v45 = vld [vmem:[%s3894_s30 + $0xf0] sm:$0xff] }
 0x58a   : > { %v1640_v50 = vsub.f32 %v3031_v0, %v1587_v55  ;;  %2024 = vst [vmem:[%s4537_s28 + $0xa8] sm:$0xff] %v1587_v55  ;;  %v1590_v12 = vpop.f32.mrb[38].mxu0  ;;  %v1710_v9 = vadd.f32 %v1670_v37, %v1669_v49  ;;  %v3041_v37 = vld [vmem:[%s3894_s30 + $0xf8] sm:$0xff]  ;;  %s3468_s30 = smov [#allocation20]  }
 0x58b   : > { %v1671_v10 = vmul.f32 %v1639_v60, %v1639_v60  ;;  %v1591_v20 = vadd.f32 %v1590_v12, %v4528_v2  ;;  %v1592_v52 = vpop.f32.mrb[39].mxu0  ;;  %s3330_s0 = sshll.u32 %s3468_s30, 4  ;;  %s3331_s0 = int_to_ptr.vmem [resolvable:$false] %s3330_s0 }
 0x58c   : > { %v1672_v4 = vmul.f32 %v1640_v50, %v1640_v50  ;;  %v1593_v63 = vadd.f32 %v1592_v52, %v4530_v3  ;;  %1711 = vadd.xlane.f32.xlu0 %v1710_v9  ;;  %s3332_s6 = scalar_lea.vmem %s3331_s0, 8192  ;;  %p3333_p11 = scmp.lt.s32.totalorder %s4643_s5, %s3331_s0 }
 0x58d   : > { %v1641_v61 = vsub.f32 %v3032_v14, %v1591_v20  ;;  %2025 = vst [vmem:[%s4537_s28 + $0xb0] sm:$0xff] %v1591_v20  ;;  %p3334_p0 = scmp.lt.s32.totalorder %s3332_s6, %s3326_s16 }
 0x58e   : > { %v1642_v11 = vsub.f32 %v3033_v7, %v1593_v63  ;;  %2026 = vst [vmem:[%s4537_s28 + $0xb8] sm:$0xff] %v1593_v63  ;;  %v1596_v13 = vpop.f32.mrb[40].mxu0  ;;  %v1713_v1 = vadd.f32 %v1672_v4, %v1671_v10 }
 0x58f   : > { %v1673_v22 = vmul.f32 %v1641_v61, %v1641_v61  ;;  %v1597_v54 = vadd.f32 %v1596_v13, %v4528_v2  ;;  %v1598_v27 = vpop.f32.mrb[41].mxu0  ;;  %p3335_p12 = por %p3334_p0, %p3333_p11 }
 0x590   : > { %v1674_v26 = vmul.f32 %v1642_v11, %v1642_v11  ;;  %v1599_v5 = vadd.f32 %v1598_v27, %v4530_v3  ;;  %1714 = vadd.xlane.f32.xlu1 %v1713_v1 }
 0x591   : > { %v1643_v23 = vsub.f32 %v3034_v32, %v1597_v54  ;;  %2027 = vst [vmem:[%s4537_s28 + $0xc0] sm:$0xff] %v1597_v54  ;;  %p3336_p13 = pnand %p3335_p12, %p3329_p8 }
 0x592   : > { %v1644_v43 = vsub.f32 %v3035_v6, %v1599_v5  ;;  %2028 = vst [vmem:[%s4537_s28 + $0xc8] sm:$0xff] %v1599_v5  ;;  %v1602_v44 = vpop.f32.mrb[42].mxu0  ;;  %v1716_v58 = vadd.f32 %v1674_v26, %v1673_v22 }
 0x593   : > { %v1675_v18 = vmul.f32 %v1643_v23, %v1643_v23  ;;  %v1603_v17 = vadd.f32 %v1602_v44, %v4528_v2  ;;  %v1604_v19 = vpop.f32.mrb[43].mxu0 }
 0x594   : > { %v1676_v24 = vmul.f32 %v1644_v43, %v1644_v43  ;;  %v1605_v36 = vadd.f32 %v1604_v19, %v4530_v3  ;;  %1717 = vadd.xlane.f32.xlu0 %v1716_v58 }
 0x595   : > { %v1645_v34 = vsub.f32 %v3036_v31, %v1603_v17  ;;  %2029 = vst [vmem:[%s4537_s28 + $0xd0] sm:$0xff] %v1603_v17 }
 0x596   : > { %v1646_v40 = vsub.f32 %v3037_v29, %v1605_v36  ;;  %2030 = vst [vmem:[%s4537_s28 + $0xd8] sm:$0xff] %v1605_v36  ;;  %v1608_v16 = vpop.f32.mrb[44].mxu0  ;;  %v1719_v35 = vadd.f32 %v1676_v24, %v1675_v18 }
 0x597   : > { %v1677_v30 = vmul.f32 %v1645_v34, %v1645_v34  ;;  %v1609_v21 = vadd.f32 %v1608_v16, %v4528_v2  ;;  %v1610_v33 = vpop.f32.mrb[45].mxu0 }
 0x598   : > { %v1678_v38 = vmul.f32 %v1646_v40, %v1646_v40  ;;  %v1611_v39 = vadd.f32 %v1610_v33, %v4530_v3  ;;  %1720 = vadd.xlane.f32.xlu1 %v1719_v35 }
 0x599   : > { %v1647_v25 = vsub.f32 %v3038_v46, %v1609_v21  ;;  %2031 = vst [vmem:[%s4537_s28 + $0xe0] sm:$0xff] %v1609_v21 }
 0x59a   : > { %v1648_v62 = vsub.f32 %v3039_v41, %v1611_v39  ;;  %2032 = vst [vmem:[%s4537_s28 + $0xe8] sm:$0xff] %v1611_v39  ;;  %v1614_v42 = vpop.f32.mrb[46].mxu0  ;;  %v1722_v8 = vadd.f32 %v1678_v38, %v1677_v30 }
 0x59b   : > { %v1679_v51 = vmul.f32 %v1647_v25, %v1647_v25  ;;  %v1615_v57 = vadd.f32 %v1614_v42, %v4528_v2  ;;  %v1616_v28 = vpop.f32.mrb[47].mxu0 }
 0x59c   : > { %v1680_v53 = vmul.f32 %v1648_v62, %v1648_v62  ;;  %v1617_v49 = vadd.f32 %v1616_v28, %v4530_v3  ;;  %1723 = vadd.xlane.f32.xlu0 %v1722_v8 }
 0x59d   : > { %v1649_v56 = vsub.f32 %v3040_v45, %v1615_v57  ;;  %2033 = vst [vmem:[%s4537_s28 + $0xf0] sm:$0xff] %v1615_v57 }
 0x59e   : > { %v1650_v55 = vsub.f32 %v3041_v37, %v1617_v49  ;;  %2034 = vst [vmem:[%s4537_s28 + $0xf8] sm:$0xff] %v1617_v49  ;;  %v1725_v59 = vadd.f32 %v1680_v53, %v1679_v51 }
 0x59f   : > { %v1681_v60 = vmul.f32 %v1649_v56, %v1649_v56 }
 0x5a0   : > { %v1682_v0 = vmul.f32 %v1650_v55, %v1650_v55  ;;  %1726 = vadd.xlane.f32.xlu1 %v1725_v59 }
 0x5a2   : > { %v1728_v2 = vadd.f32 %v1682_v0, %v1681_v60 }
 0x5a4   : > { %1729 = vadd.xlane.f32.xlu0 %v1728_v2 }
 0x5b1   : > { %2098 = vrot.lane.b32.xlu1 %v4358_v48, %s3466_s2 }
 0x5ba   : > { %2096 = vrot.lane.b32.xlu0 %v4355_v47, %s3466_s2 }
 0x5bb   : > { %3339 = shalt.err (!%p3336_p13)
}
 0x5bc   : > { %s3340_s14 = scalar_lea.hbm %s4641_s24, 4096  ;;  %s3344_s10 = scalar_lea.hbm %s4917_s7, 8192 }
 0x5bd   : > { %p3341_p1 = scmp.ne.s32.totalorder %s4641_s24, %s3340_s14  ;;  %p3345_p2 = scmp.lt.u32.totalorder %s4641_s24, %s4917_s7 }
 0x5be   : > { %p3346_p4 = scmp.lt.u32.totalorder %s3344_s10, %s3340_s14  ;;  %p3348_p5 = scmp.lt.u32.totalorder %s3340_s14, %s4641_s24 }
 0x5bf   : > { %p3342_p3 = pnand %p3341_p1, %p4918_p7 }
 0x5c0   : > { %p3347_p10 = por %p3346_p4, %p3345_p2 }
 0x5c1   : > { %p3343_p6 = pneg %p3342_p3 }
 0x5c2   : > { %p3349_p9 = por %p3348_p5, %p3347_p10 }
 0x5c4   : > { %p3350_p8 = pnand %p3349_p9, %p3343_p6 }
 0x5c6   : > { %3353 = shalt.err (!%p3350_p8)
}
 0x5c7   : > { %s3469_s3 = smov 256   ;;  %s3470_s26 = smov 16   ;;  %v1944_v47 = vpop.xlane.xlu0 %1943  ;;  %v1941_v48 = vpop.xlane.xlu1 %1940  ;;  %vm2133_vm3 = vcmask 794368   ;;  %vm2150_vm4 = vcmask 802568   ;;  %vm2167_vm5 = vcmask 1048336  }
 0x5c8   : > { %2866 = dma.vmem_to_hbm [thread:$0]  (%p4918_p7), %s4643_s5, 4096, %s4641_s24, %s2190_s4, %s3469_s3, %s3469_s3, %s3470_s26   ;;  %v1987_v13 = vmul.f32 -0.5, %v1941_v48  ;;  %v1988_v54 = vmul.f32 -0.5, %v1944_v47 }
 0x5c9   : > { %s2486_s5 = sshll.u32 %s3555_s23, 11  ;;  %s2203_s12 = sshll.u32 %s4023_s15, 4  ;;  %s4800_s12 = int_to_ptr.vmem [resolvable:$true] %s2203_s12 }
 0x5ca   : > { %s4919_s16 = sld [smem:[#allocation39_spill]]  ;;  %s2185_s23 = scalar_lea.sflag [#allocation4], %s3888_s21 }
 0x5cb   : > { %v1947_v3 = vpop.xlane.xlu0 %1946  ;;  %v1950_v50 = vpop.xlane.xlu1 %1949  ;;  %s3354_s0 = scalar_lea.vmem %s4800_s12, 2048  ;;  %s3471_s6 = smov [#allocation19]  }
 0x5cc   : > { %v1989_v26 = vmul.f32 -0.5, %v1947_v3  ;;  %v1990_v32 = vmul.f32 -0.5, %v1950_v50  ;;  %p3355_p11 = scmp.ne.s32.totalorder %s4800_s12, %s3354_s0  ;;  %s3358_s14 = sshll.u32 %s3471_s6, 4  ;;  %s3359_s14 = int_to_ptr.vmem [resolvable:$false] %s3358_s14 }
 0x5cd   : > { %s3360_s13 = scalar_lea.vmem %s3359_s14, 4096  ;;  %p3361_p13 = scmp.lt.s32.totalorder %s4800_s12, %s3359_s14 }
 0x5ce   : > { %p3356_p0 = pnand %p3355_p11, %p4918_p7  ;;  %p3362_p1 = scmp.lt.s32.totalorder %s3360_s13, %s3354_s0 }
 0x5cf   : > { %v1953_v12 = vpop.xlane.xlu0 %1952  ;;  %v1956_v9 = vpop.xlane.xlu1 %1955 }
 0x5d0   : > { %v1991_v6 = vmul.f32 -0.5, %v1953_v12  ;;  %v1992_v44 = vmul.f32 -0.5, %v1956_v9  ;;  %s4798_s30 = scalar_lea.hbm %s4919_s16, %s2486_s5  ;;  %p3357_p12 = pneg %p3356_p0 }
 0x5d1   : > { %p3363_p3 = por %p3362_p1, %p3361_p13 }
 0x5d3   : > { %v1959_v10 = vpop.xlane.xlu0 %1958  ;;  %v1962_v20 = vpop.xlane.xlu1 %1961  ;;  %p3364_p6 = pnand %p3363_p3, %p3357_p12 }
 0x5d4   : > { %v1993_v18 = vmul.f32 -0.5, %v1959_v10  ;;  %v1994_v19 = vmul.f32 -0.5, %v1962_v20 }
 0x5d7   : > { %v1965_v52 = vpop.xlane.xlu0 %1964  ;;  %v1968_v4 = vpop.xlane.xlu1 %1967 }
 0x5d8   : > { %v1995_v36 = vmul.f32 -0.5, %v1965_v52  ;;  %v1996_v34 = vmul.f32 -0.5, %v1968_v4 }
 0x5db   : > { %v1971_v63 = vpop.xlane.xlu0 %1970  ;;  %v4669_v14 = vpop.xlane.xlu1 %1973 }
 0x5dc   : > { %v1997_v40 = vmul.f32 -0.5, %v1971_v63  ;;  %v1998_v35 = vmul.f32 -0.5, %v4669_v14 }
 0x5df   : > { %v4671_v61 = vpop.xlane.xlu0 %1976  ;;  %v4673_v7 = vpop.xlane.xlu1 %1979 }
 0x5e0   : > { %v1999_v21 = vmul.f32 -0.5, %v4671_v61  ;;  %v2000_v38 = vmul.f32 -0.5, %v4673_v7 }
 0x5e3   : > { %v4675_v11 = vpop.xlane.xlu0 %1982  ;;  %v4677_v1 = vpop.xlane.xlu1 %1985 }
 0x5e4   : > { %v2002_v62 = vmul.f32 -0.5, %v4677_v1  ;;  %v2001_v8 = vmul.f32 -0.5, %v4675_v11 }
 0x5f5   : > { %v1685_v22 = vpop.xlane.xlu0 %1684 }
 0x5f6   : > { %2134 = vst.msk [vmem:[%s4023_s15] sm:$0xff] %vm2133_vm3, %v1685_v22 }
 0x5f7   : > { %2151 = vst.msk [vmem:[%s4023_s15] sm:$0xff] %vm2150_vm4, %v1987_v13 }
 0x5f8   : > { %2168 = vst.msk [vmem:[%s4023_s15] sm:$0xff] %vm2167_vm5, %v3467_v15 }
 0x5f9   : > { %v1688_v27 = vpop.xlane.xlu1 %1687 }
 0x5fa   : > { %2135 = vst.msk [vmem:[%s4023_s15 + $0x8] sm:$0xff] %vm2133_vm3, %v1688_v27 }
 0x5fb   : > { %2152 = vst.msk [vmem:[%s4023_s15 + $0x8] sm:$0xff] %vm2150_vm4, %v1988_v54 }
 0x5fc   : > { %2169 = vst.msk [vmem:[%s4023_s15 + $0x8] sm:$0xff] %vm2167_vm5, %v3467_v15 }
 0x5fd   : > { %v1691_v5 = vpop.xlane.xlu0 %1690 }
 0x5fe   : > { %2136 = vst.msk [vmem:[%s4023_s15 + $0x10] sm:$0xff] %vm2133_vm3, %v1691_v5 }
 0x5ff   : > { %2153 = vst.msk [vmem:[%s4023_s15 + $0x10] sm:$0xff] %vm2150_vm4, %v1989_v26 }
 0x600   : > { %2170 = vst.msk [vmem:[%s4023_s15 + $0x10] sm:$0xff] %vm2167_vm5, %v3467_v15 }
 0x601   : > { %v1694_v23 = vpop.xlane.xlu0 %1693 }
 0x602   : > { %2137 = vst.msk [vmem:[%s4023_s15 + $0x18] sm:$0xff] %vm2133_vm3, %v1694_v23 }
 0x603   : > { %2154 = vst.msk [vmem:[%s4023_s15 + $0x18] sm:$0xff] %vm2150_vm4, %v1990_v32 }
 0x604   : > { %2171 = vst.msk [vmem:[%s4023_s15 + $0x18] sm:$0xff] %vm2167_vm5, %v3467_v15 }
 0x605   : > { %v1697_v43 = vpop.xlane.xlu1 %1696 }
 0x606   : > { %2138 = vst.msk [vmem:[%s4023_s15 + $0x20] sm:$0xff] %vm2133_vm3, %v1697_v43 }
 0x607   : > { %2155 = vst.msk [vmem:[%s4023_s15 + $0x20] sm:$0xff] %vm2150_vm4, %v1991_v6 }
 0x608   : > { %2172 = vst.msk [vmem:[%s4023_s15 + $0x20] sm:$0xff] %vm2167_vm5, %v3467_v15 }
 0x609   : > { %v1700_v58 = vpop.xlane.xlu0 %1699 }
 0x60a   : > { %2139 = vst.msk [vmem:[%s4023_s15 + $0x28] sm:$0xff] %vm2133_vm3, %v1700_v58 }
 0x60b   : > { %2156 = vst.msk [vmem:[%s4023_s15 + $0x28] sm:$0xff] %vm2150_vm4, %v1992_v44 }
 0x60c   : > { %2173 = vst.msk [vmem:[%s4023_s15 + $0x28] sm:$0xff] %vm2167_vm5, %v3467_v15 }
 0x60d   : > { %v1703_v17 = vpop.xlane.xlu1 %1702 }
 0x60e   : > { %2140 = vst.msk [vmem:[%s4023_s15 + $0x30] sm:$0xff] %vm2133_vm3, %v1703_v17 }
 0x60f   : > { %2157 = vst.msk [vmem:[%s4023_s15 + $0x30] sm:$0xff] %vm2150_vm4, %v1993_v18 }
 0x610   : > { %2174 = vst.msk [vmem:[%s4023_s15 + $0x30] sm:$0xff] %vm2167_vm5, %v3467_v15 }
 0x611   : > { %v1706_v24 = vpop.xlane.xlu0 %1705 }
 0x612   : > { %2141 = vst.msk [vmem:[%s4023_s15 + $0x38] sm:$0xff] %vm2133_vm3, %v1706_v24 }
 0x613   : > { %2158 = vst.msk [vmem:[%s4023_s15 + $0x38] sm:$0xff] %vm2150_vm4, %v1994_v19 }
 0x614   : > { %2175 = vst.msk [vmem:[%s4023_s15 + $0x38] sm:$0xff] %vm2167_vm5, %v3467_v15 }
 0x615   : > { %v1709_v31 = vpop.xlane.xlu1 %1708 }
 0x616   : > { %2142 = vst.msk [vmem:[%s4023_s15 + $0x40] sm:$0xff] %vm2133_vm3, %v1709_v31 }
 0x617   : > { %2159 = vst.msk [vmem:[%s4023_s15 + $0x40] sm:$0xff] %vm2150_vm4, %v1995_v36 }
 0x618   : > { %2176 = vst.msk [vmem:[%s4023_s15 + $0x40] sm:$0xff] %vm2167_vm5, %v3467_v15 }
 0x619   : > { %v1712_v29 = vpop.xlane.xlu0 %1711 }
 0x61a   : > { %2143 = vst.msk [vmem:[%s4023_s15 + $0x48] sm:$0xff] %vm2133_vm3, %v1712_v29 }
 0x61b   : > { %2160 = vst.msk [vmem:[%s4023_s15 + $0x48] sm:$0xff] %vm2150_vm4, %v1996_v34 }
 0x61c   : > { %2177 = vst.msk [vmem:[%s4023_s15 + $0x48] sm:$0xff] %vm2167_vm5, %v3467_v15 }
 0x61d   : > { %v1715_v16 = vpop.xlane.xlu1 %1714 }
 0x61e   : > { %2144 = vst.msk [vmem:[%s4023_s15 + $0x50] sm:$0xff] %vm2133_vm3, %v1715_v16 }
 0x61f   : > { %2161 = vst.msk [vmem:[%s4023_s15 + $0x50] sm:$0xff] %vm2150_vm4, %v1997_v40 }
 0x620   : > { %2178 = vst.msk [vmem:[%s4023_s15 + $0x50] sm:$0xff] %vm2167_vm5, %v3467_v15 }
 0x621   : > { %v1718_v30 = vpop.xlane.xlu0 %1717 }
 0x622   : > { %2145 = vst.msk [vmem:[%s4023_s15 + $0x58] sm:$0xff] %vm2133_vm3, %v1718_v30 }
 0x623   : > { %2162 = vst.msk [vmem:[%s4023_s15 + $0x58] sm:$0xff] %vm2150_vm4, %v1998_v35 }
 0x624   : > { %2179 = vst.msk [vmem:[%s4023_s15 + $0x58] sm:$0xff] %vm2167_vm5, %v3467_v15 }
 0x625   : > { %v1721_v33 = vpop.xlane.xlu1 %1720 }
 0x626   : > { %2146 = vst.msk [vmem:[%s4023_s15 + $0x60] sm:$0xff] %vm2133_vm3, %v1721_v33 }
 0x627   : > { %2163 = vst.msk [vmem:[%s4023_s15 + $0x60] sm:$0xff] %vm2150_vm4, %v1999_v21 }
 0x628   : > { %2180 = vst.msk [vmem:[%s4023_s15 + $0x60] sm:$0xff] %vm2167_vm5, %v3467_v15 }
 0x629   : > { %v1724_v39 = vpop.xlane.xlu0 %1723 }
 0x62a   : > { %2147 = vst.msk [vmem:[%s4023_s15 + $0x68] sm:$0xff] %vm2133_vm3, %v1724_v39 }
 0x62b   : > { %2164 = vst.msk [vmem:[%s4023_s15 + $0x68] sm:$0xff] %vm2150_vm4, %v2000_v38 }
 0x62c   : > { %2181 = vst.msk [vmem:[%s4023_s15 + $0x68] sm:$0xff] %vm2167_vm5, %v3467_v15 }
 0x62d   : > { %v1727_v46 = vpop.xlane.xlu1 %1726 }
 0x631   : > { %v2099_v25 = vpop.permute.xlu1 %2098  ;;  %v1730_v41 = vpop.xlane.xlu0 %1729 }
 0x632   : > { %2132 = vst.msk [vmem:[%s4023_s15 + $0x78] sm:$0xff] %vm2116_vm2, %v2099_v25 }
 0x633   : > { %2149 = vst.msk [vmem:[%s4023_s15 + $0x78] sm:$0xff] %vm2133_vm3, %v1730_v41 }
 0x634   : > { %2166 = vst.msk [vmem:[%s4023_s15 + $0x78] sm:$0xff] %vm2150_vm4, %v2002_v62 }
 0x635   : > { %2183 = vst.msk [vmem:[%s4023_s15 + $0x78] sm:$0xff] %vm2167_vm5, %v3467_v15  ;;  %v2097_v42 = vpop.permute.xlu0 %2096 }
 0x636   : > { %2131 = vst.msk [vmem:[%s4023_s15 + $0x70] sm:$0xff] %vm2116_vm2, %v2097_v42 }
 0x637   : > { %2148 = vst.msk [vmem:[%s4023_s15 + $0x70] sm:$0xff] %vm2133_vm3, %v1727_v46 }
 0x638   : > { %2165 = vst.msk [vmem:[%s4023_s15 + $0x70] sm:$0xff] %vm2150_vm4, %v2001_v8 }
 0x639   : > { %2182 = vst.msk [vmem:[%s4023_s15 + $0x70] sm:$0xff] %vm2167_vm5, %v3467_v15 }
 0x63a   : > { %3367 = shalt.err (!%p3364_p6)
}
 0x63b   : > { %s3368_s15 = scalar_lea.hbm %s4798_s30, 2048  ;;  %s3372_s2 = scalar_lea.hbm %s4919_s16, 4096 }
 0x63c   : > { %p3369_p2 = scmp.ne.s32.totalorder %s4798_s30, %s3368_s15  ;;  %p3373_p5 = scmp.lt.u32.totalorder %s4798_s30, %s4919_s16 }
 0x63d   : > { %p3374_p9 = scmp.lt.u32.totalorder %s3372_s2, %s3368_s15  ;;  %p3376_p11 = scmp.lt.u32.totalorder %s3368_s15, %s4798_s30 }
 0x63e   : > { %p3370_p4 = pnand %p3369_p2, %p4918_p7 }
 0x63f   : > { %p3375_p8 = por %p3374_p9, %p3373_p5 }
 0x640   : > { %p3371_p10 = pneg %p3370_p4 }
 0x641   : > { %p3377_p0 = por %p3376_p11, %p3375_p8 }
 0x643   : > { %p3378_p12 = pnand %p3377_p0, %p3371_p10 }
 0x645   : > { %3381 = shalt.err (!%p3378_p12)
}
 0x646   : > { %s3472_s26 = smov 128   ;;  %s3473_s5 = smov 8  }
 0x647   : > { %2865 = dma.vmem_to_hbm [thread:$0]  (%p4918_p7), %s4800_s12, 2048, %s4798_s30, %s2185_s23, %s3472_s26, %s3472_s26, %s3473_s5  }
 0x648 PF: > { %s2235_s24 = sand.u32 1, %s3436_s17   ;;  %p4920_p13 = scmp.ne.s32.totalorder %s4898_s29, 0 }
 0x649   : > { %p4921_p1 = scmp.ge.s32.totalorder %s3448_s20, 2  ;;  %s2236_s4 = scalar_lea.sflag [#allocation4], %s2235_s24 }
 0x64b   : > { %p2902_p3 = pnand %p4921_p1, %p4920_p13 }
 0x64d   : > { %3427 = dma.done.wait (!%p2902_p3), %s2236_s4, 2048  }
 0x64e   : > { %3429 = vsyncadd (!%p2902_p3), %s2236_s4, 4294965248  ;;  %s2245_s0 = scalar_lea.sflag [#allocation21], %s2235_s24 }
 0x64f   : > { %3431 = dma.done.wait (!%p2902_p3), %s2245_s0, 4096  }
 0x650   : > { %3433 = vsyncadd (!%p2902_p3), %s2245_s0, 4294963200  ;;  %p35_p7 = scmp.ge.s32.totalorder %s3760_s27, 4   ;;  %s4922_s17 = smov %s3440_s18 }
 0x651   : > { %s4923_s18 = smov %s3444_s19  ;;  %s4924_s19 = smov %s3771_s22 }
 0x652   : > { %s4925_s20 = smov %s3760_s27  ;;  %37 = sbr.rel (!%p35_p7) target bundleno = 23 (0x17), region = 167 }
 0x659   :  { %2250 = vsyncpa [#allocation3], 1 }
 0x65a   :  { %2252 = vsyncpa [#allocation3 + $0x1], 1 }
 0x65b   :  { %2253 = vsyncpa [#allocation6], 1 }
 0x65c   :  { %2255 = vsyncpa [#allocation6 + $0x1], 1 }
 0x65d   :  { %2256 = vsyncpa [#allocation9], 1 }
 0x65e   :  { %2257 = vsyncpa [#allocation12], 1 }
 0x65f   :  { %2258 = vsyncpa [#allocation15], 1 }
 0x660   :  { %2259 = vsyncpa [#allocation18], 1 }
 0x661   :  { %2260 = vsyncpa [#allocation4], 1 }
 0x662   :  { %2262 = vsyncpa [#allocation4 + $0x1], 1 }
 0x663   :  { %2263 = vsyncpa [#allocation21], 1 }
 0x664   :  { %2265 = vsyncpa [#allocation21 + $0x1], 1 }

</bundles_post_ra>
